<compile_context>
chip_gen: v6e
topology: v6e:2x2x1
jax: 0.10.0
libtpu: 0.0.40
codegen_flags: <defaults>
</compile_context>

<pallas_src>
import jax
import jax.numpy as jnp
import numpy as np
from jax.experimental import pallas as pl
from jax.experimental.pallas import tpu as pltpu

# Model / problem sizes (small, consistent with the module's __init__).
HIDDEN = 32          # hidden_size
EMBED = 16           # embedding_size
CLUSTERS = 6         # len(vocabs_in)
OUT = 10             # output_size (= len(vocab_out))
LAYERS = 2           # num_layers
SEQ = 8              # sequence length
PER_CLUSTER = 2      # sentences per cluster -> B = 12
VOCAB = 40           # per-cluster vocab size
D_IN = EMBED + CLUSTERS


def clustering_lstm_kernel(x_ref, w_ih0, w_hh0, b0, w_ih1, w_hh1, b1,
                           fcw, fcb, out_ref):
    """Fused 2-layer LSTM + fc + log-softmax.

    x_ref : [T*Bp, D_IN] bf16, time-major, batch padded to a sublane multiple.
    w_ih0 : [D_IN, 4H] bf16; w_hh0/w_ih1/w_hh1: [H, 4H] bf16 (gate order i,f,o,g).
    b0/b1 : [1, 4H] f32 (bias_ih + bias_hh pre-summed, reordered).
    fcw   : [H, OUT] bf16; fcb: [1, OUT] f32.
    out_ref: [Bp, OUT] f32 log-softmax outputs.
    """
    H = HIDDEN
    Bp = out_ref.shape[0]
    T = x_ref.shape[0] // Bp

    # Hoisted, time-independent layer-0 input projection: one big MXU matmul
    # off the serial recurrence chain.
    xproj = jnp.dot(x_ref[...], w_ih0[...],
                    preferred_element_type=jnp.float32) + b0[...]   # [T*Bp, 4H]

    whh0 = w_hh0[...]
    wih1 = w_ih1[...]
    whh1 = w_hh1[...]
    b1v = b1[...]

    def cell(gates, c_prev):
        # gate columns are [i | f | o | g]
        sig = jax.nn.sigmoid(gates[:, :3 * H])
        g = jnp.tanh(gates[:, 3 * H:])
        i = sig[:, :H]
        f = sig[:, H:2 * H]
        o = sig[:, 2 * H:3 * H]
        c = f * c_prev + i * g
        h = o * jnp.tanh(c)
        return h, c

    h0 = jnp.zeros((Bp, H), jnp.float32)
    c0 = jnp.zeros((Bp, H), jnp.float32)
    h1 = jnp.zeros((Bp, H), jnp.float32)
    c1 = jnp.zeros((Bp, H), jnp.float32)

    # Fully unrolled fused (wavefront) time loop; states live in vregs only.
    for t in range(T):
        gates0 = xproj[t * Bp:(t + 1) * Bp, :] + jnp.dot(
            h0.astype(jnp.bfloat16), whh0, preferred_element_type=jnp.float32)
        h0, c0 = cell(gates0, c0)
        gates1 = (jnp.dot(h0.astype(jnp.bfloat16), wih1,
                          preferred_element_type=jnp.float32)
                  + jnp.dot(h1.astype(jnp.bfloat16), whh1,
                            preferred_element_type=jnp.float32)
                  + b1v)
        h1, c1 = cell(gates1, c1)

    # fc on last time step + LogSoftmax(dim=1).
    logits = jnp.dot(h1.astype(jnp.bfloat16), fcw[...],
                     preferred_element_type=jnp.float32) + fcb[...]   # [Bp, OUT]
    m = jnp.max(logits, axis=1, keepdims=True)
    z = logits - m
    lse = jnp.log(jnp.sum(jnp.exp(z), axis=1, keepdims=True))
    out_ref[...] = z - lse


# ----------------------------- wrapper / glue ---------------------------------

def _gate_reorder_perm():
    # PyTorch LSTM gate order (i, f, g, o) -> kernel order (i, f, o, g).
    H = HIDDEN
    return np.concatenate([np.arange(0, H), np.arange(H, 2 * H),
                           np.arange(3 * H, 4 * H), np.arange(2 * H, 3 * H)])


def _prep_lstm_weights(w_ih, w_hh, b):
    perm = _gate_reorder_perm()
    w_ih_t = jnp.asarray(w_ih)[perm].T.astype(jnp.bfloat16)   # [in, 4H]
    w_hh_t = jnp.asarray(w_hh)[perm].T.astype(jnp.bfloat16)   # [H, 4H]
    b_r = jnp.asarray(b)[:, perm].astype(jnp.float32)         # [1, 4H]
    return w_ih_t, w_hh_t, b_r


def clustering_lstm_pallas(x_btd, params):
    B, T, _ = x_btd.shape
    Bp = ((B + 7) // 8) * 8                         # pad batch to sublane multiple
    x_tbd = jnp.transpose(x_btd, (1, 0, 2))         # [T, B, D_IN]
    x_tbd = jnp.pad(x_tbd, ((0, 0), (0, Bp - B), (0, 0)))
    x_flat = x_tbd.reshape(T * Bp, D_IN).astype(jnp.bfloat16)

    w_ih0_t, w_hh0_t, b0_r = _prep_lstm_weights(params["w_ih0"],
                                                params["w_hh0"], params["b0"])
    w_ih1_t, w_hh1_t, b1_r = _prep_lstm_weights(params["w_ih1"],
                                                params["w_hh1"], params["b1"])
    fcw_t = params["fcw"].T.astype(jnp.bfloat16)                 # [H, OUT]
    fcb = params["fcb"].astype(jnp.float32)

    out = pl.pallas_call(
        clustering_lstm_kernel,
        out_shape=jax.ShapeDtypeStruct((Bp, OUT), jnp.float32),
        in_specs=[pl.BlockSpec(memory_space=pltpu.MemorySpace.VMEM)] * 9,
        out_specs=pl.BlockSpec(memory_space=pltpu.MemorySpace.VMEM),
    )(x_flat, w_ih0_t, w_hh0_t, b0_r, w_ih1_t, w_hh1_t, b1_r, fcw_t, fcb)
    return out[:B]


# ------------------------- plain-JAX glue & reference -------------------------

def init_params(key):
    ks = jax.random.split(key, 10)
    scale = 0.1
    params = {
        "w_ih0": scale * jax.random.normal(ks[0], (4 * HIDDEN, D_IN), jnp.float32),
        "w_hh0": scale * jax.random.normal(ks[1], (4 * HIDDEN, HIDDEN), jnp.float32),
        "b0": scale * jax.random.normal(ks[2], (1, 4 * HIDDEN), jnp.float32),
        "w_ih1": scale * jax.random.normal(ks[3], (4 * HIDDEN, HIDDEN), jnp.float32),
        "w_hh1": scale * jax.random.normal(ks[4], (4 * HIDDEN, HIDDEN), jnp.float32),
        "b1": scale * jax.random.normal(ks[5], (1, 4 * HIDDEN), jnp.float32),
        "fcw": scale * jax.random.normal(ks[6], (OUT, HIDDEN), jnp.float32),
        "fcb": scale * jax.random.normal(ks[7], (1, OUT), jnp.float32),
    }
    # per-cluster embedding tables; row 0 is the padding_idx row (zeros).
    emb = scale * jax.random.normal(ks[8], (CLUSTERS, VOCAB, EMBED), jnp.float32)
    emb = emb.at[:, 0, :].set(0.0)
    params["embeddings"] = emb
    return params


def embed_and_concat(token_ids, emb_tables):
    """token_ids: [C, N, T] int32 -> [B, T, E+C] with one-hot cluster id."""
    outs = []
    for c in range(CLUSTERS):
        e = emb_tables[c][token_ids[c]]                        # [N, T, E]
        one_hot = jnp.zeros((CLUSTERS,), jnp.float32).at[c].set(1.0)
        one_hot = jnp.broadcast_to(one_hot, (e.shape[0], e.shape[1], CLUSTERS))
        outs.append(jnp.concatenate([e, one_hot], axis=2))
    return jnp.concatenate(outs, axis=0)                       # [B, T, E+C]


def reference_forward(x_btd, params):
    """Pure-JAX reference of the LSTM + fc + log_softmax path (f32, PyTorch gate order)."""
    w_ih = [params["w_ih0"], params["w_ih1"]]
    w_hh = [params["w_hh0"], params["w_hh1"]]
    bias = [params["b0"], params["b1"]]
    B, T, _ = x_btd.shape
    inp = x_btd
    for l in range(LAYERS):
        h = jnp.zeros((B, HIDDEN), jnp.float32)
        c = jnp.zeros((B, HIDDEN), jnp.float32)
        hs = []
        for t in range(T):
            gates = inp[:, t, :] @ w_ih[l].T + h @ w_hh[l].T + bias[l]
            i = jax.nn.sigmoid(gates[:, 0 * HIDDEN:1 * HIDDEN])
            f = jax.nn.sigmoid(gates[:, 1 * HIDDEN:2 * HIDDEN])
            g = jnp.tanh(gates[:, 2 * HIDDEN:3 * HIDDEN])
            o = jax.nn.sigmoid(gates[:, 3 * HIDDEN:4 * HIDDEN])
            c = f * c + i * g
            h = o * jnp.tanh(c)
            hs.append(h)
        inp = jnp.stack(hs, axis=1)
    logits = inp[:, -1, :] @ params["fcw"].T + params["fcb"]
    return jax.nn.log_softmax(logits, axis=1)


if __name__ == "__main__":
    key = jax.random.PRNGKey(0)
    k_param, k_tok = jax.random.split(key)
    params = init_params(k_param)

    # Synthetic x: Dict[cluster -> list of token sequences], dense & equal-length.
    token_ids = jax.random.randint(k_tok, (CLUSTERS, PER_CLUSTER, SEQ), 1, VOCAB,
                                   dtype=jnp.int32)

    x_btd = embed_and_concat(token_ids, params["embeddings"])   # [B, T, E+C]

    out = clustering_lstm_pallas(x_btd, params)
    out = jax.block_until_ready(out)

    ref = jax.block_until_ready(reference_forward(x_btd, params))
    np.testing.assert_allclose(np.asarray(out), np.asarray(ref),
                               rtol=5e-2, atol=5e-2)
    assert out.shape == (CLUSTERS * PER_CLUSTER, OUT)
    print("KERNEL_OK")
</pallas_src>

<mosaic_0001>
module attributes {stable_mosaic.version = 11 : i64} {
  func.func @clustering_lstm_kernel(%arg0: memref<128x22xbf16, #tpu.memory_space<vmem>>, %arg1: memref<22x128xbf16, #tpu.memory_space<vmem>>, %arg2: memref<32x128xbf16, #tpu.memory_space<vmem>>, %arg3: memref<1x128xf32, #tpu.memory_space<vmem>>, %arg4: memref<32x128xbf16, #tpu.memory_space<vmem>>, %arg5: memref<32x128xbf16, #tpu.memory_space<vmem>>, %arg6: memref<1x128xf32, #tpu.memory_space<vmem>>, %arg7: memref<32x10xbf16, #tpu.memory_space<vmem>>, %arg8: memref<1x10xf32, #tpu.memory_space<vmem>>, %arg9: memref<16x10xf32, #tpu.memory_space<vmem>>) attributes {dimension_semantics = [], scalar_prefetch = 0 : i64, scratch_operands = 0 : i64, tpu.core_type = #tpu.core_type<tc>} {
    %c0 = arith.constant 0 : index
    %c0_0 = arith.constant 0 : index
    %0 = vector.load %arg0[%c0, %c0_0] : memref<128x22xbf16, #tpu.memory_space<vmem>>, vector<128x22xbf16>
    %c0_1 = arith.constant 0 : index
    %c0_2 = arith.constant 0 : index
    %1 = vector.load %arg1[%c0_1, %c0_2] : memref<22x128xbf16, #tpu.memory_space<vmem>>, vector<22x128xbf16>
    %cst = arith.constant dense<0.000000e+00> : vector<128x128xf32>
    %2 = tpu.matmul %0, %1, %cst {dimension_numbers = #tpu.dot_dimension_numbers<[1], [0], [0], [1], [0, 0, 1, 1], [], []>} : vector<128x22xbf16>, vector<22x128xbf16>, vector<128x128xf32> -> vector<128x128xf32>
    %c0_3 = arith.constant 0 : index
    %c0_4 = arith.constant 0 : index
    %3 = vector.load %arg3[%c0_3, %c0_4] : memref<1x128xf32, #tpu.memory_space<vmem>>, vector<1x128xf32>
    %4 = vector.broadcast %3 : vector<1x128xf32> to vector<128x128xf32>
    %5 = arith.addf %2, %4 : vector<128x128xf32>
    %c0_5 = arith.constant 0 : index
    %c0_6 = arith.constant 0 : index
    %6 = vector.load %arg2[%c0_5, %c0_6] : memref<32x128xbf16, #tpu.memory_space<vmem>>, vector<32x128xbf16>
    %c0_7 = arith.constant 0 : index
    %c0_8 = arith.constant 0 : index
    %7 = vector.load %arg4[%c0_7, %c0_8] : memref<32x128xbf16, #tpu.memory_space<vmem>>, vector<32x128xbf16>
    %c0_9 = arith.constant 0 : index
    %c0_10 = arith.constant 0 : index
    %8 = vector.load %arg5[%c0_9, %c0_10] : memref<32x128xbf16, #tpu.memory_space<vmem>>, vector<32x128xbf16>
    %c0_11 = arith.constant 0 : index
    %c0_12 = arith.constant 0 : index
    %9 = vector.load %arg6[%c0_11, %c0_12] : memref<1x128xf32, #tpu.memory_space<vmem>>, vector<1x128xf32>
    %cst_13 = arith.constant 0.000000e+00 : f32
    %10 = vector.broadcast %cst_13 : f32 to vector<16x32xf32>
    %cst_14 = arith.constant 0.000000e+00 : f32
    %11 = vector.broadcast %cst_14 : f32 to vector<16x32xf32>
    %cst_15 = arith.constant 0.000000e+00 : f32
    %12 = vector.broadcast %cst_15 : f32 to vector<16x32xf32>
    %cst_16 = arith.constant 0.000000e+00 : f32
    %13 = vector.broadcast %cst_16 : f32 to vector<16x32xf32>
    %14 = vector.extract_strided_slice %5 {offsets = [0, 0], sizes = [16, 128], strides = [1, 1]} : vector<128x128xf32> to vector<16x128xf32>
    %15 = arith.truncf %10 : vector<16x32xf32> to vector<16x32xbf16>
    %cst_17 = arith.constant dense<0.000000e+00> : vector<16x128xf32>
    %16 = tpu.matmul %15, %6, %cst_17 {dimension_numbers = #tpu.dot_dimension_numbers<[1], [0], [0], [1], [0, 0, 1, 1], [], []>} : vector<16x32xbf16>, vector<32x128xbf16>, vector<16x128xf32> -> vector<16x128xf32>
    %17 = arith.addf %14, %16 : vector<16x128xf32>
    %18 = vector.extract_strided_slice %17 {offsets = [0, 0], sizes = [16, 96], strides = [1, 1]} : vector<16x128xf32> to vector<16x96xf32>
    %19 = arith.negf %18 : vector<16x96xf32>
    %20 = math.exp %19 : vector<16x96xf32>
    %cst_18 = arith.constant 1.000000e+00 : f32
    %21 = vector.broadcast %cst_18 : f32 to vector<16x96xf32>
    %22 = arith.addf %21, %20 : vector<16x96xf32>
    %23 = arith.divf %21, %22 : vector<16x96xf32>
    %24 = vector.extract_strided_slice %17 {offsets = [0, 96], sizes = [16, 32], strides = [1, 1]} : vector<16x128xf32> to vector<16x32xf32>
    %25 = math.tanh %24 : vector<16x32xf32>
    %26 = vector.extract_strided_slice %23 {offsets = [0, 0], sizes = [16, 32], strides = [1, 1]} : vector<16x96xf32> to vector<16x32xf32>
    %27 = vector.extract_strided_slice %23 {offsets = [0, 32], sizes = [16, 32], strides = [1, 1]} : vector<16x96xf32> to vector<16x32xf32>
    %28 = vector.extract_strided_slice %23 {offsets = [0, 64], sizes = [16, 32], strides = [1, 1]} : vector<16x96xf32> to vector<16x32xf32>
    %29 = arith.mulf %27, %11 : vector<16x32xf32>
    %30 = arith.mulf %26, %25 : vector<16x32xf32>
    %31 = arith.addf %29, %30 : vector<16x32xf32>
    %32 = math.tanh %31 : vector<16x32xf32>
    %33 = arith.mulf %28, %32 : vector<16x32xf32>
    %34 = arith.truncf %33 : vector<16x32xf32> to vector<16x32xbf16>
    %cst_19 = arith.constant dense<0.000000e+00> : vector<16x128xf32>
    %35 = tpu.matmul %34, %7, %cst_19 {dimension_numbers = #tpu.dot_dimension_numbers<[1], [0], [0], [1], [0, 0, 1, 1], [], []>} : vector<16x32xbf16>, vector<32x128xbf16>, vector<16x128xf32> -> vector<16x128xf32>
    %36 = arith.truncf %12 : vector<16x32xf32> to vector<16x32xbf16>
    %cst_20 = arith.constant dense<0.000000e+00> : vector<16x128xf32>
    %37 = tpu.matmul %36, %8, %cst_20 {dimension_numbers = #tpu.dot_dimension_numbers<[1], [0], [0], [1], [0, 0, 1, 1], [], []>} : vector<16x32xbf16>, vector<32x128xbf16>, vector<16x128xf32> -> vector<16x128xf32>
    %38 = arith.addf %35, %37 : vector<16x128xf32>
    %39 = vector.broadcast %9 : vector<1x128xf32> to vector<16x128xf32>
    %40 = arith.addf %38, %39 : vector<16x128xf32>
    %41 = vector.extract_strided_slice %40 {offsets = [0, 0], sizes = [16, 96], strides = [1, 1]} : vector<16x128xf32> to vector<16x96xf32>
    %42 = arith.negf %41 : vector<16x96xf32>
    %43 = math.exp %42 : vector<16x96xf32>
    %cst_21 = arith.constant 1.000000e+00 : f32
    %44 = vector.broadcast %cst_21 : f32 to vector<16x96xf32>
    %45 = arith.addf %44, %43 : vector<16x96xf32>
    %46 = arith.divf %44, %45 : vector<16x96xf32>
    %47 = vector.extract_strided_slice %40 {offsets = [0, 96], sizes = [16, 32], strides = [1, 1]} : vector<16x128xf32> to vector<16x32xf32>
    %48 = math.tanh %47 : vector<16x32xf32>
    %49 = vector.extract_strided_slice %46 {offsets = [0, 0], sizes = [16, 32], strides = [1, 1]} : vector<16x96xf32> to vector<16x32xf32>
    %50 = vector.extract_strided_slice %46 {offsets = [0, 32], sizes = [16, 32], strides = [1, 1]} : vector<16x96xf32> to vector<16x32xf32>
    %51 = vector.extract_strided_slice %46 {offsets = [0, 64], sizes = [16, 32], strides = [1, 1]} : vector<16x96xf32> to vector<16x32xf32>
    %52 = arith.mulf %50, %13 : vector<16x32xf32>
    %53 = arith.mulf %49, %48 : vector<16x32xf32>
    %54 = arith.addf %52, %53 : vector<16x32xf32>
    %55 = math.tanh %54 : vector<16x32xf32>
    %56 = arith.mulf %51, %55 : vector<16x32xf32>
    %57 = vector.extract_strided_slice %5 {offsets = [16, 0], sizes = [16, 128], strides = [1, 1]} : vector<128x128xf32> to vector<16x128xf32>
    %58 = arith.truncf %33 : vector<16x32xf32> to vector<16x32xbf16>
    %cst_22 = arith.constant dense<0.000000e+00> : vector<16x128xf32>
    %59 = tpu.matmul %58, %6, %cst_22 {dimension_numbers = #tpu.dot_dimension_numbers<[1], [0], [0], [1], [0, 0, 1, 1], [], []>} : vector<16x32xbf16>, vector<32x128xbf16>, vector<16x128xf32> -> vector<16x128xf32>
    %60 = arith.addf %57, %59 : vector<16x128xf32>
    %61 = vector.extract_strided_slice %60 {offsets = [0, 0], sizes = [16, 96], strides = [1, 1]} : vector<16x128xf32> to vector<16x96xf32>
    %62 = arith.negf %61 : vector<16x96xf32>
    %63 = math.exp %62 : vector<16x96xf32>
    %cst_23 = arith.constant 1.000000e+00 : f32
    %64 = vector.broadcast %cst_23 : f32 to vector<16x96xf32>
    %65 = arith.addf %64, %63 : vector<16x96xf32>
    %66 = arith.divf %64, %65 : vector<16x96xf32>
    %67 = vector.extract_strided_slice %60 {offsets = [0, 96], sizes = [16, 32], strides = [1, 1]} : vector<16x128xf32> to vector<16x32xf32>
    %68 = math.tanh %67 : vector<16x32xf32>
    %69 = vector.extract_strided_slice %66 {offsets = [0, 0], sizes = [16, 32], strides = [1, 1]} : vector<16x96xf32> to vector<16x32xf32>
    %70 = vector.extract_strided_slice %66 {offsets = [0, 32], sizes = [16, 32], strides = [1, 1]} : vector<16x96xf32> to vector<16x32xf32>
    %71 = vector.extract_strided_slice %66 {offsets = [0, 64], sizes = [16, 32], strides = [1, 1]} : vector<16x96xf32> to vector<16x32xf32>
    %72 = arith.mulf %70, %31 : vector<16x32xf32>
    %73 = arith.mulf %69, %68 : vector<16x32xf32>
    %74 = arith.addf %72, %73 : vector<16x32xf32>
    %75 = math.tanh %74 : vector<16x32xf32>
    %76 = arith.mulf %71, %75 : vector<16x32xf32>
    %77 = arith.truncf %76 : vector<16x32xf32> to vector<16x32xbf16>
    %cst_24 = arith.constant dense<0.000000e+00> : vector<16x128xf32>
    %78 = tpu.matmul %77, %7, %cst_24 {dimension_numbers = #tpu.dot_dimension_numbers<[1], [0], [0], [1], [0, 0, 1, 1], [], []>} : vector<16x32xbf16>, vector<32x128xbf16>, vector<16x128xf32> -> vector<16x128xf32>
    %79 = arith.truncf %56 : vector<16x32xf32> to vector<16x32xbf16>
    %cst_25 = arith.constant dense<0.000000e+00> : vector<16x128xf32>
    %80 = tpu.matmul %79, %8, %cst_25 {dimension_numbers = #tpu.dot_dimension_numbers<[1], [0], [0], [1], [0, 0, 1, 1], [], []>} : vector<16x32xbf16>, vector<32x128xbf16>, vector<16x128xf32> -> vector<16x128xf32>
    %81 = arith.addf %78, %80 : vector<16x128xf32>
    %82 = vector.broadcast %9 : vector<1x128xf32> to vector<16x128xf32>
    %83 = arith.addf %81, %82 : vector<16x128xf32>
    %84 = vector.extract_strided_slice %83 {offsets = [0, 0], sizes = [16, 96], strides = [1, 1]} : vector<16x128xf32> to vector<16x96xf32>
    %85 = arith.negf %84 : vector<16x96xf32>
    %86 = math.exp %85 : vector<16x96xf32>
    %cst_26 = arith.constant 1.000000e+00 : f32
    %87 = vector.broadcast %cst_26 : f32 to vector<16x96xf32>
    %88 = arith.addf %87, %86 : vector<16x96xf32>
    %89 = arith.divf %87, %88 : vector<16x96xf32>
    %90 = vector.extract_strided_slice %83 {offsets = [0, 96], sizes = [16, 32], strides = [1, 1]} : vector<16x128xf32> to vector<16x32xf32>
    %91 = math.tanh %90 : vector<16x32xf32>
    %92 = vector.extract_strided_slice %89 {offsets = [0, 0], sizes = [16, 32], strides = [1, 1]} : vector<16x96xf32> to vector<16x32xf32>
    %93 = vector.extract_strided_slice %89 {offsets = [0, 32], sizes = [16, 32], strides = [1, 1]} : vector<16x96xf32> to vector<16x32xf32>
    %94 = vector.extract_strided_slice %89 {offsets = [0, 64], sizes = [16, 32], strides = [1, 1]} : vector<16x96xf32> to vector<16x32xf32>
    %95 = arith.mulf %93, %54 : vector<16x32xf32>
    %96 = arith.mulf %92, %91 : vector<16x32xf32>
    %97 = arith.addf %95, %96 : vector<16x32xf32>
    %98 = math.tanh %97 : vector<16x32xf32>
    %99 = arith.mulf %94, %98 : vector<16x32xf32>
    %100 = vector.extract_strided_slice %5 {offsets = [32, 0], sizes = [16, 128], strides = [1, 1]} : vector<128x128xf32> to vector<16x128xf32>
    %101 = arith.truncf %76 : vector<16x32xf32> to vector<16x32xbf16>
    %cst_27 = arith.constant dense<0.000000e+00> : vector<16x128xf32>
    %102 = tpu.matmul %101, %6, %cst_27 {dimension_numbers = #tpu.dot_dimension_numbers<[1], [0], [0], [1], [0, 0, 1, 1], [], []>} : vector<16x32xbf16>, vector<32x128xbf16>, vector<16x128xf32> -> vector<16x128xf32>
    %103 = arith.addf %100, %102 : vector<16x128xf32>
    %104 = vector.extract_strided_slice %103 {offsets = [0, 0], sizes = [16, 96], strides = [1, 1]} : vector<16x128xf32> to vector<16x96xf32>
    %105 = arith.negf %104 : vector<16x96xf32>
    %106 = math.exp %105 : vector<16x96xf32>
    %cst_28 = arith.constant 1.000000e+00 : f32
    %107 = vector.broadcast %cst_28 : f32 to vector<16x96xf32>
    %108 = arith.addf %107, %106 : vector<16x96xf32>
    %109 = arith.divf %107, %108 : vector<16x96xf32>
    %110 = vector.extract_strided_slice %103 {offsets = [0, 96], sizes = [16, 32], strides = [1, 1]} : vector<16x128xf32> to vector<16x32xf32>
    %111 = math.tanh %110 : vector<16x32xf32>
    %112 = vector.extract_strided_slice %109 {offsets = [0, 0], sizes = [16, 32], strides = [1, 1]} : vector<16x96xf32> to vector<16x32xf32>
    %113 = vector.extract_strided_slice %109 {offsets = [0, 32], sizes = [16, 32], strides = [1, 1]} : vector<16x96xf32> to vector<16x32xf32>
    %114 = vector.extract_strided_slice %109 {offsets = [0, 64], sizes = [16, 32], strides = [1, 1]} : vector<16x96xf32> to vector<16x32xf32>
    %115 = arith.mulf %113, %74 : vector<16x32xf32>
    %116 = arith.mulf %112, %111 : vector<16x32xf32>
    %117 = arith.addf %115, %116 : vector<16x32xf32>
    %118 = math.tanh %117 : vector<16x32xf32>
    %119 = arith.mulf %114, %118 : vector<16x32xf32>
    %120 = arith.truncf %119 : vector<16x32xf32> to vector<16x32xbf16>
    %cst_29 = arith.constant dense<0.000000e+00> : vector<16x128xf32>
    %121 = tpu.matmul %120, %7, %cst_29 {dimension_numbers = #tpu.dot_dimension_numbers<[1], [0], [0], [1], [0, 0, 1, 1], [], []>} : vector<16x32xbf16>, vector<32x128xbf16>, vector<16x128xf32> -> vector<16x128xf32>
    %122 = arith.truncf %99 : vector<16x32xf32> to vector<16x32xbf16>
    %cst_30 = arith.constant dense<0.000000e+00> : vector<16x128xf32>
    %123 = tpu.matmul %122, %8, %cst_30 {dimension_numbers = #tpu.dot_dimension_numbers<[1], [0], [0], [1], [0, 0, 1, 1], [], []>} : vector<16x32xbf16>, vector<32x128xbf16>, vector<16x128xf32> -> vector<16x128xf32>
    %124 = arith.addf %121, %123 : vector<16x128xf32>
    %125 = vector.broadcast %9 : vector<1x128xf32> to vector<16x128xf32>
    %126 = arith.addf %124, %125 : vector<16x128xf32>
    %127 = vector.extract_strided_slice %126 {offsets = [0, 0], sizes = [16, 96], strides = [1, 1]} : vector<16x128xf32> to vector<16x96xf32>
    %128 = arith.negf %127 : vector<16x96xf32>
    %129 = math.exp %128 : vector<16x96xf32>
    %cst_31 = arith.constant 1.000000e+00 : f32
    %130 = vector.broadcast %cst_31 : f32 to vector<16x96xf32>
    %131 = arith.addf %130, %129 : vector<16x96xf32>
    %132 = arith.divf %130, %131 : vector<16x96xf32>
    %133 = vector.extract_strided_slice %126 {offsets = [0, 96], sizes = [16, 32], strides = [1, 1]} : vector<16x128xf32> to vector<16x32xf32>
    %134 = math.tanh %133 : vector<16x32xf32>
    %135 = vector.extract_strided_slice %132 {offsets = [0, 0], sizes = [16, 32], strides = [1, 1]} : vector<16x96xf32> to vector<16x32xf32>
    %136 = vector.extract_strided_slice %132 {offsets = [0, 32], sizes = [16, 32], strides = [1, 1]} : vector<16x96xf32> to vector<16x32xf32>
    %137 = vector.extract_strided_slice %132 {offsets = [0, 64], sizes = [16, 32], strides = [1, 1]} : vector<16x96xf32> to vector<16x32xf32>
    %138 = arith.mulf %136, %97 : vector<16x32xf32>
    %139 = arith.mulf %135, %134 : vector<16x32xf32>
    %140 = arith.addf %138, %139 : vector<16x32xf32>
    %141 = math.tanh %140 : vector<16x32xf32>
    %142 = arith.mulf %137, %141 : vector<16x32xf32>
    %143 = vector.extract_strided_slice %5 {offsets = [48, 0], sizes = [16, 128], strides = [1, 1]} : vector<128x128xf32> to vector<16x128xf32>
    %144 = arith.truncf %119 : vector<16x32xf32> to vector<16x32xbf16>
    %cst_32 = arith.constant dense<0.000000e+00> : vector<16x128xf32>
    %145 = tpu.matmul %144, %6, %cst_32 {dimension_numbers = #tpu.dot_dimension_numbers<[1], [0], [0], [1], [0, 0, 1, 1], [], []>} : vector<16x32xbf16>, vector<32x128xbf16>, vector<16x128xf32> -> vector<16x128xf32>
    %146 = arith.addf %143, %145 : vector<16x128xf32>
    %147 = vector.extract_strided_slice %146 {offsets = [0, 0], sizes = [16, 96], strides = [1, 1]} : vector<16x128xf32> to vector<16x96xf32>
    %148 = arith.negf %147 : vector<16x96xf32>
    %149 = math.exp %148 : vector<16x96xf32>
    %cst_33 = arith.constant 1.000000e+00 : f32
    %150 = vector.broadcast %cst_33 : f32 to vector<16x96xf32>
    %151 = arith.addf %150, %149 : vector<16x96xf32>
    %152 = arith.divf %150, %151 : vector<16x96xf32>
    %153 = vector.extract_strided_slice %146 {offsets = [0, 96], sizes = [16, 32], strides = [1, 1]} : vector<16x128xf32> to vector<16x32xf32>
    %154 = math.tanh %153 : vector<16x32xf32>
    %155 = vector.extract_strided_slice %152 {offsets = [0, 0], sizes = [16, 32], strides = [1, 1]} : vector<16x96xf32> to vector<16x32xf32>
    %156 = vector.extract_strided_slice %152 {offsets = [0, 32], sizes = [16, 32], strides = [1, 1]} : vector<16x96xf32> to vector<16x32xf32>
    %157 = vector.extract_strided_slice %152 {offsets = [0, 64], sizes = [16, 32], strides = [1, 1]} : vector<16x96xf32> to vector<16x32xf32>
    %158 = arith.mulf %156, %117 : vector<16x32xf32>
    %159 = arith.mulf %155, %154 : vector<16x32xf32>
    %160 = arith.addf %158, %159 : vector<16x32xf32>
    %161 = math.tanh %160 : vector<16x32xf32>
    %162 = arith.mulf %157, %161 : vector<16x32xf32>
    %163 = arith.truncf %162 : vector<16x32xf32> to vector<16x32xbf16>
    %cst_34 = arith.constant dense<0.000000e+00> : vector<16x128xf32>
    %164 = tpu.matmul %163, %7, %cst_34 {dimension_numbers = #tpu.dot_dimension_numbers<[1], [0], [0], [1], [0, 0, 1, 1], [], []>} : vector<16x32xbf16>, vector<32x128xbf16>, vector<16x128xf32> -> vector<16x128xf32>
    %165 = arith.truncf %142 : vector<16x32xf32> to vector<16x32xbf16>
    %cst_35 = arith.constant dense<0.000000e+00> : vector<16x128xf32>
    %166 = tpu.matmul %165, %8, %cst_35 {dimension_numbers = #tpu.dot_dimension_numbers<[1], [0], [0], [1], [0, 0, 1, 1], [], []>} : vector<16x32xbf16>, vector<32x128xbf16>, vector<16x128xf32> -> vector<16x128xf32>
    %167 = arith.addf %164, %166 : vector<16x128xf32>
    %168 = vector.broadcast %9 : vector<1x128xf32> to vector<16x128xf32>
    %169 = arith.addf %167, %168 : vector<16x128xf32>
    %170 = vector.extract_strided_slice %169 {offsets = [0, 0], sizes = [16, 96], strides = [1, 1]} : vector<16x128xf32> to vector<16x96xf32>
    %171 = arith.negf %170 : vector<16x96xf32>
    %172 = math.exp %171 : vector<16x96xf32>
    %cst_36 = arith.constant 1.000000e+00 : f32
    %173 = vector.broadcast %cst_36 : f32 to vector<16x96xf32>
    %174 = arith.addf %173, %172 : vector<16x96xf32>
    %175 = arith.divf %173, %174 : vector<16x96xf32>
    %176 = vector.extract_strided_slice %169 {offsets = [0, 96], sizes = [16, 32], strides = [1, 1]} : vector<16x128xf32> to vector<16x32xf32>
    %177 = math.tanh %176 : vector<16x32xf32>
    %178 = vector.extract_strided_slice %175 {offsets = [0, 0], sizes = [16, 32], strides = [1, 1]} : vector<16x96xf32> to vector<16x32xf32>
    %179 = vector.extract_strided_slice %175 {offsets = [0, 32], sizes = [16, 32], strides = [1, 1]} : vector<16x96xf32> to vector<16x32xf32>
    %180 = vector.extract_strided_slice %175 {offsets = [0, 64], sizes = [16, 32], strides = [1, 1]} : vector<16x96xf32> to vector<16x32xf32>
    %181 = arith.mulf %179, %140 : vector<16x32xf32>
    %182 = arith.mulf %178, %177 : vector<16x32xf32>
    %183 = arith.addf %181, %182 : vector<16x32xf32>
    %184 = math.tanh %183 : vector<16x32xf32>
    %185 = arith.mulf %180, %184 : vector<16x32xf32>
    %186 = vector.extract_strided_slice %5 {offsets = [64, 0], sizes = [16, 128], strides = [1, 1]} : vector<128x128xf32> to vector<16x128xf32>
    %187 = arith.truncf %162 : vector<16x32xf32> to vector<16x32xbf16>
    %cst_37 = arith.constant dense<0.000000e+00> : vector<16x128xf32>
    %188 = tpu.matmul %187, %6, %cst_37 {dimension_numbers = #tpu.dot_dimension_numbers<[1], [0], [0], [1], [0, 0, 1, 1], [], []>} : vector<16x32xbf16>, vector<32x128xbf16>, vector<16x128xf32> -> vector<16x128xf32>
    %189 = arith.addf %186, %188 : vector<16x128xf32>
    %190 = vector.extract_strided_slice %189 {offsets = [0, 0], sizes = [16, 96], strides = [1, 1]} : vector<16x128xf32> to vector<16x96xf32>
    %191 = arith.negf %190 : vector<16x96xf32>
    %192 = math.exp %191 : vector<16x96xf32>
    %cst_38 = arith.constant 1.000000e+00 : f32
    %193 = vector.broadcast %cst_38 : f32 to vector<16x96xf32>
    %194 = arith.addf %193, %192 : vector<16x96xf32>
    %195 = arith.divf %193, %194 : vector<16x96xf32>
    %196 = vector.extract_strided_slice %189 {offsets = [0, 96], sizes = [16, 32], strides = [1, 1]} : vector<16x128xf32> to vector<16x32xf32>
    %197 = math.tanh %196 : vector<16x32xf32>
    %198 = vector.extract_strided_slice %195 {offsets = [0, 0], sizes = [16, 32], strides = [1, 1]} : vector<16x96xf32> to vector<16x32xf32>
    %199 = vector.extract_strided_slice %195 {offsets = [0, 32], sizes = [16, 32], strides = [1, 1]} : vector<16x96xf32> to vector<16x32xf32>
    %200 = vector.extract_strided_slice %195 {offsets = [0, 64], sizes = [16, 32], strides = [1, 1]} : vector<16x96xf32> to vector<16x32xf32>
    %201 = arith.mulf %199, %160 : vector<16x32xf32>
    %202 = arith.mulf %198, %197 : vector<16x32xf32>
    %203 = arith.addf %201, %202 : vector<16x32xf32>
    %204 = math.tanh %203 : vector<16x32xf32>
    %205 = arith.mulf %200, %204 : vector<16x32xf32>
    %206 = arith.truncf %205 : vector<16x32xf32> to vector<16x32xbf16>
    %cst_39 = arith.constant dense<0.000000e+00> : vector<16x128xf32>
    %207 = tpu.matmul %206, %7, %cst_39 {dimension_numbers = #tpu.dot_dimension_numbers<[1], [0], [0], [1], [0, 0, 1, 1], [], []>} : vector<16x32xbf16>, vector<32x128xbf16>, vector<16x128xf32> -> vector<16x128xf32>
    %208 = arith.truncf %185 : vector<16x32xf32> to vector<16x32xbf16>
    %cst_40 = arith.constant dense<0.000000e+00> : vector<16x128xf32>
    %209 = tpu.matmul %208, %8, %cst_40 {dimension_numbers = #tpu.dot_dimension_numbers<[1], [0], [0], [1], [0, 0, 1, 1], [], []>} : vector<16x32xbf16>, vector<32x128xbf16>, vector<16x128xf32> -> vector<16x128xf32>
    %210 = arith.addf %207, %209 : vector<16x128xf32>
    %211 = vector.broadcast %9 : vector<1x128xf32> to vector<16x128xf32>
    %212 = arith.addf %210, %211 : vector<16x128xf32>
    %213 = vector.extract_strided_slice %212 {offsets = [0, 0], sizes = [16, 96], strides = [1, 1]} : vector<16x128xf32> to vector<16x96xf32>
    %214 = arith.negf %213 : vector<16x96xf32>
    %215 = math.exp %214 : vector<16x96xf32>
    %cst_41 = arith.constant 1.000000e+00 : f32
    %216 = vector.broadcast %cst_41 : f32 to vector<16x96xf32>
    %217 = arith.addf %216, %215 : vector<16x96xf32>
    %218 = arith.divf %216, %217 : vector<16x96xf32>
    %219 = vector.extract_strided_slice %212 {offsets = [0, 96], sizes = [16, 32], strides = [1, 1]} : vector<16x128xf32> to vector<16x32xf32>
    %220 = math.tanh %219 : vector<16x32xf32>
    %221 = vector.extract_strided_slice %218 {offsets = [0, 0], sizes = [16, 32], strides = [1, 1]} : vector<16x96xf32> to vector<16x32xf32>
    %222 = vector.extract_strided_slice %218 {offsets = [0, 32], sizes = [16, 32], strides = [1, 1]} : vector<16x96xf32> to vector<16x32xf32>
    %223 = vector.extract_strided_slice %218 {offsets = [0, 64], sizes = [16, 32], strides = [1, 1]} : vector<16x96xf32> to vector<16x32xf32>
    %224 = arith.mulf %222, %183 : vector<16x32xf32>
    %225 = arith.mulf %221, %220 : vector<16x32xf32>
    %226 = arith.addf %224, %225 : vector<16x32xf32>
    %227 = math.tanh %226 : vector<16x32xf32>
    %228 = arith.mulf %223, %227 : vector<16x32xf32>
    %229 = vector.extract_strided_slice %5 {offsets = [80, 0], sizes = [16, 128], strides = [1, 1]} : vector<128x128xf32> to vector<16x128xf32>
    %230 = arith.truncf %205 : vector<16x32xf32> to vector<16x32xbf16>
    %cst_42 = arith.constant dense<0.000000e+00> : vector<16x128xf32>
    %231 = tpu.matmul %230, %6, %cst_42 {dimension_numbers = #tpu.dot_dimension_numbers<[1], [0], [0], [1], [0, 0, 1, 1], [], []>} : vector<16x32xbf16>, vector<32x128xbf16>, vector<16x128xf32> -> vector<16x128xf32>
    %232 = arith.addf %229, %231 : vector<16x128xf32>
    %233 = vector.extract_strided_slice %232 {offsets = [0, 0], sizes = [16, 96], strides = [1, 1]} : vector<16x128xf32> to vector<16x96xf32>
    %234 = arith.negf %233 : vector<16x96xf32>
    %235 = math.exp %234 : vector<16x96xf32>
    %cst_43 = arith.constant 1.000000e+00 : f32
    %236 = vector.broadcast %cst_43 : f32 to vector<16x96xf32>
    %237 = arith.addf %236, %235 : vector<16x96xf32>
    %238 = arith.divf %236, %237 : vector<16x96xf32>
    %239 = vector.extract_strided_slice %232 {offsets = [0, 96], sizes = [16, 32], strides = [1, 1]} : vector<16x128xf32> to vector<16x32xf32>
    %240 = math.tanh %239 : vector<16x32xf32>
    %241 = vector.extract_strided_slice %238 {offsets = [0, 0], sizes = [16, 32], strides = [1, 1]} : vector<16x96xf32> to vector<16x32xf32>
    %242 = vector.extract_strided_slice %238 {offsets = [0, 32], sizes = [16, 32], strides = [1, 1]} : vector<16x96xf32> to vector<16x32xf32>
    %243 = vector.extract_strided_slice %238 {offsets = [0, 64], sizes = [16, 32], strides = [1, 1]} : vector<16x96xf32> to vector<16x32xf32>
    %244 = arith.mulf %242, %203 : vector<16x32xf32>
    %245 = arith.mulf %241, %240 : vector<16x32xf32>
    %246 = arith.addf %244, %245 : vector<16x32xf32>
    %247 = math.tanh %246 : vector<16x32xf32>
    %248 = arith.mulf %243, %247 : vector<16x32xf32>
    %249 = arith.truncf %248 : vector<16x32xf32> to vector<16x32xbf16>
    %cst_44 = arith.constant dense<0.000000e+00> : vector<16x128xf32>
    %250 = tpu.matmul %249, %7, %cst_44 {dimension_numbers = #tpu.dot_dimension_numbers<[1], [0], [0], [1], [0, 0, 1, 1], [], []>} : vector<16x32xbf16>, vector<32x128xbf16>, vector<16x128xf32> -> vector<16x128xf32>
    %251 = arith.truncf %228 : vector<16x32xf32> to vector<16x32xbf16>
    %cst_45 = arith.constant dense<0.000000e+00> : vector<16x128xf32>
    %252 = tpu.matmul %251, %8, %cst_45 {dimension_numbers = #tpu.dot_dimension_numbers<[1], [0], [0], [1], [0, 0, 1, 1], [], []>} : vector<16x32xbf16>, vector<32x128xbf16>, vector<16x128xf32> -> vector<16x128xf32>
    %253 = arith.addf %250, %252 : vector<16x128xf32>
    %254 = vector.broadcast %9 : vector<1x128xf32> to vector<16x128xf32>
    %255 = arith.addf %253, %254 : vector<16x128xf32>
    %256 = vector.extract_strided_slice %255 {offsets = [0, 0], sizes = [16, 96], strides = [1, 1]} : vector<16x128xf32> to vector<16x96xf32>
    %257 = arith.negf %256 : vector<16x96xf32>
    %258 = math.exp %257 : vector<16x96xf32>
    %cst_46 = arith.constant 1.000000e+00 : f32
    %259 = vector.broadcast %cst_46 : f32 to vector<16x96xf32>
    %260 = arith.addf %259, %258 : vector<16x96xf32>
    %261 = arith.divf %259, %260 : vector<16x96xf32>
    %262 = vector.extract_strided_slice %255 {offsets = [0, 96], sizes = [16, 32], strides = [1, 1]} : vector<16x128xf32> to vector<16x32xf32>
    %263 = math.tanh %262 : vector<16x32xf32>
    %264 = vector.extract_strided_slice %261 {offsets = [0, 0], sizes = [16, 32], strides = [1, 1]} : vector<16x96xf32> to vector<16x32xf32>
    %265 = vector.extract_strided_slice %261 {offsets = [0, 32], sizes = [16, 32], strides = [1, 1]} : vector<16x96xf32> to vector<16x32xf32>
    %266 = vector.extract_strided_slice %261 {offsets = [0, 64], sizes = [16, 32], strides = [1, 1]} : vector<16x96xf32> to vector<16x32xf32>
    %267 = arith.mulf %265, %226 : vector<16x32xf32>
    %268 = arith.mulf %264, %263 : vector<16x32xf32>
    %269 = arith.addf %267, %268 : vector<16x32xf32>
    %270 = math.tanh %269 : vector<16x32xf32>
    %271 = arith.mulf %266, %270 : vector<16x32xf32>
    %272 = vector.extract_strided_slice %5 {offsets = [96, 0], sizes = [16, 128], strides = [1, 1]} : vector<128x128xf32> to vector<16x128xf32>
    %273 = arith.truncf %248 : vector<16x32xf32> to vector<16x32xbf16>
    %cst_47 = arith.constant dense<0.000000e+00> : vector<16x128xf32>
    %274 = tpu.matmul %273, %6, %cst_47 {dimension_numbers = #tpu.dot_dimension_numbers<[1], [0], [0], [1], [0, 0, 1, 1], [], []>} : vector<16x32xbf16>, vector<32x128xbf16>, vector<16x128xf32> -> vector<16x128xf32>
    %275 = arith.addf %272, %274 : vector<16x128xf32>
    %276 = vector.extract_strided_slice %275 {offsets = [0, 0], sizes = [16, 96], strides = [1, 1]} : vector<16x128xf32> to vector<16x96xf32>
    %277 = arith.negf %276 : vector<16x96xf32>
    %278 = math.exp %277 : vector<16x96xf32>
    %cst_48 = arith.constant 1.000000e+00 : f32
    %279 = vector.broadcast %cst_48 : f32 to vector<16x96xf32>
    %280 = arith.addf %279, %278 : vector<16x96xf32>
    %281 = arith.divf %279, %280 : vector<16x96xf32>
    %282 = vector.extract_strided_slice %275 {offsets = [0, 96], sizes = [16, 32], strides = [1, 1]} : vector<16x128xf32> to vector<16x32xf32>
    %283 = math.tanh %282 : vector<16x32xf32>
    %284 = vector.extract_strided_slice %281 {offsets = [0, 0], sizes = [16, 32], strides = [1, 1]} : vector<16x96xf32> to vector<16x32xf32>
    %285 = vector.extract_strided_slice %281 {offsets = [0, 32], sizes = [16, 32], strides = [1, 1]} : vector<16x96xf32> to vector<16x32xf32>
    %286 = vector.extract_strided_slice %281 {offsets = [0, 64], sizes = [16, 32], strides = [1, 1]} : vector<16x96xf32> to vector<16x32xf32>
    %287 = arith.mulf %285, %246 : vector<16x32xf32>
    %288 = arith.mulf %284, %283 : vector<16x32xf32>
    %289 = arith.addf %287, %288 : vector<16x32xf32>
    %290 = math.tanh %289 : vector<16x32xf32>
    %291 = arith.mulf %286, %290 : vector<16x32xf32>
    %292 = arith.truncf %291 : vector<16x32xf32> to vector<16x32xbf16>
    %cst_49 = arith.constant dense<0.000000e+00> : vector<16x128xf32>
    %293 = tpu.matmul %292, %7, %cst_49 {dimension_numbers = #tpu.dot_dimension_numbers<[1], [0], [0], [1], [0, 0, 1, 1], [], []>} : vector<16x32xbf16>, vector<32x128xbf16>, vector<16x128xf32> -> vector<16x128xf32>
    %294 = arith.truncf %271 : vector<16x32xf32> to vector<16x32xbf16>
    %cst_50 = arith.constant dense<0.000000e+00> : vector<16x128xf32>
    %295 = tpu.matmul %294, %8, %cst_50 {dimension_numbers = #tpu.dot_dimension_numbers<[1], [0], [0], [1], [0, 0, 1, 1], [], []>} : vector<16x32xbf16>, vector<32x128xbf16>, vector<16x128xf32> -> vector<16x128xf32>
    %296 = arith.addf %293, %295 : vector<16x128xf32>
    %297 = vector.broadcast %9 : vector<1x128xf32> to vector<16x128xf32>
    %298 = arith.addf %296, %297 : vector<16x128xf32>
    %299 = vector.extract_strided_slice %298 {offsets = [0, 0], sizes = [16, 96], strides = [1, 1]} : vector<16x128xf32> to vector<16x96xf32>
    %300 = arith.negf %299 : vector<16x96xf32>
    %301 = math.exp %300 : vector<16x96xf32>
    %cst_51 = arith.constant 1.000000e+00 : f32
    %302 = vector.broadcast %cst_51 : f32 to vector<16x96xf32>
    %303 = arith.addf %302, %301 : vector<16x96xf32>
    %304 = arith.divf %302, %303 : vector<16x96xf32>
    %305 = vector.extract_strided_slice %298 {offsets = [0, 96], sizes = [16, 32], strides = [1, 1]} : vector<16x128xf32> to vector<16x32xf32>
    %306 = math.tanh %305 : vector<16x32xf32>
    %307 = vector.extract_strided_slice %304 {offsets = [0, 0], sizes = [16, 32], strides = [1, 1]} : vector<16x96xf32> to vector<16x32xf32>
    %308 = vector.extract_strided_slice %304 {offsets = [0, 32], sizes = [16, 32], strides = [1, 1]} : vector<16x96xf32> to vector<16x32xf32>
    %309 = vector.extract_strided_slice %304 {offsets = [0, 64], sizes = [16, 32], strides = [1, 1]} : vector<16x96xf32> to vector<16x32xf32>
    %310 = arith.mulf %308, %269 : vector<16x32xf32>
    %311 = arith.mulf %307, %306 : vector<16x32xf32>
    %312 = arith.addf %310, %311 : vector<16x32xf32>
    %313 = math.tanh %312 : vector<16x32xf32>
    %314 = arith.mulf %309, %313 : vector<16x32xf32>
    %315 = vector.extract_strided_slice %5 {offsets = [112, 0], sizes = [16, 128], strides = [1, 1]} : vector<128x128xf32> to vector<16x128xf32>
    %316 = arith.truncf %291 : vector<16x32xf32> to vector<16x32xbf16>
    %cst_52 = arith.constant dense<0.000000e+00> : vector<16x128xf32>
    %317 = tpu.matmul %316, %6, %cst_52 {dimension_numbers = #tpu.dot_dimension_numbers<[1], [0], [0], [1], [0, 0, 1, 1], [], []>} : vector<16x32xbf16>, vector<32x128xbf16>, vector<16x128xf32> -> vector<16x128xf32>
    %318 = arith.addf %315, %317 : vector<16x128xf32>
    %319 = vector.extract_strided_slice %318 {offsets = [0, 0], sizes = [16, 96], strides = [1, 1]} : vector<16x128xf32> to vector<16x96xf32>
    %320 = arith.negf %319 : vector<16x96xf32>
    %321 = math.exp %320 : vector<16x96xf32>
    %cst_53 = arith.constant 1.000000e+00 : f32
    %322 = vector.broadcast %cst_53 : f32 to vector<16x96xf32>
    %323 = arith.addf %322, %321 : vector<16x96xf32>
    %324 = arith.divf %322, %323 : vector<16x96xf32>
    %325 = vector.extract_strided_slice %318 {offsets = [0, 96], sizes = [16, 32], strides = [1, 1]} : vector<16x128xf32> to vector<16x32xf32>
    %326 = math.tanh %325 : vector<16x32xf32>
    %327 = vector.extract_strided_slice %324 {offsets = [0, 0], sizes = [16, 32], strides = [1, 1]} : vector<16x96xf32> to vector<16x32xf32>
    %328 = vector.extract_strided_slice %324 {offsets = [0, 32], sizes = [16, 32], strides = [1, 1]} : vector<16x96xf32> to vector<16x32xf32>
    %329 = vector.extract_strided_slice %324 {offsets = [0, 64], sizes = [16, 32], strides = [1, 1]} : vector<16x96xf32> to vector<16x32xf32>
    %330 = arith.mulf %328, %289 : vector<16x32xf32>
    %331 = arith.mulf %327, %326 : vector<16x32xf32>
    %332 = arith.addf %330, %331 : vector<16x32xf32>
    %333 = math.tanh %332 : vector<16x32xf32>
    %334 = arith.mulf %329, %333 : vector<16x32xf32>
    %335 = arith.truncf %334 : vector<16x32xf32> to vector<16x32xbf16>
    %cst_54 = arith.constant dense<0.000000e+00> : vector<16x128xf32>
    %336 = tpu.matmul %335, %7, %cst_54 {dimension_numbers = #tpu.dot_dimension_numbers<[1], [0], [0], [1], [0, 0, 1, 1], [], []>} : vector<16x32xbf16>, vector<32x128xbf16>, vector<16x128xf32> -> vector<16x128xf32>
    %337 = arith.truncf %314 : vector<16x32xf32> to vector<16x32xbf16>
    %cst_55 = arith.constant dense<0.000000e+00> : vector<16x128xf32>
    %338 = tpu.matmul %337, %8, %cst_55 {dimension_numbers = #tpu.dot_dimension_numbers<[1], [0], [0], [1], [0, 0, 1, 1], [], []>} : vector<16x32xbf16>, vector<32x128xbf16>, vector<16x128xf32> -> vector<16x128xf32>
    %339 = arith.addf %336, %338 : vector<16x128xf32>
    %340 = vector.broadcast %9 : vector<1x128xf32> to vector<16x128xf32>
    %341 = arith.addf %339, %340 : vector<16x128xf32>
    %342 = vector.extract_strided_slice %341 {offsets = [0, 0], sizes = [16, 96], strides = [1, 1]} : vector<16x128xf32> to vector<16x96xf32>
    %343 = arith.negf %342 : vector<16x96xf32>
    %344 = math.exp %343 : vector<16x96xf32>
    %cst_56 = arith.constant 1.000000e+00 : f32
    %345 = vector.broadcast %cst_56 : f32 to vector<16x96xf32>
    %346 = arith.addf %345, %344 : vector<16x96xf32>
    %347 = arith.divf %345, %346 : vector<16x96xf32>
    %348 = vector.extract_strided_slice %341 {offsets = [0, 96], sizes = [16, 32], strides = [1, 1]} : vector<16x128xf32> to vector<16x32xf32>
    %349 = math.tanh %348 : vector<16x32xf32>
    %350 = vector.extract_strided_slice %347 {offsets = [0, 0], sizes = [16, 32], strides = [1, 1]} : vector<16x96xf32> to vector<16x32xf32>
    %351 = vector.extract_strided_slice %347 {offsets = [0, 32], sizes = [16, 32], strides = [1, 1]} : vector<16x96xf32> to vector<16x32xf32>
    %352 = vector.extract_strided_slice %347 {offsets = [0, 64], sizes = [16, 32], strides = [1, 1]} : vector<16x96xf32> to vector<16x32xf32>
    %353 = arith.mulf %351, %312 : vector<16x32xf32>
    %354 = arith.mulf %350, %349 : vector<16x32xf32>
    %355 = arith.addf %353, %354 : vector<16x32xf32>
    %356 = math.tanh %355 : vector<16x32xf32>
    %357 = arith.mulf %352, %356 : vector<16x32xf32>
    %358 = arith.truncf %357 : vector<16x32xf32> to vector<16x32xbf16>
    %c0_57 = arith.constant 0 : index
    %c0_58 = arith.constant 0 : index
    %359 = vector.load %arg7[%c0_57, %c0_58] : memref<32x10xbf16, #tpu.memory_space<vmem>>, vector<32x10xbf16>
    %cst_59 = arith.constant dense<0.000000e+00> : vector<16x10xf32>
    %360 = tpu.matmul %358, %359, %cst_59 {dimension_numbers = #tpu.dot_dimension_numbers<[1], [0], [0], [1], [0, 0, 1, 1], [], []>} : vector<16x32xbf16>, vector<32x10xbf16>, vector<16x10xf32> -> vector<16x10xf32>
    %c0_60 = arith.constant 0 : index
    %c0_61 = arith.constant 0 : index
    %361 = vector.load %arg8[%c0_60, %c0_61] : memref<1x10xf32, #tpu.memory_space<vmem>>, vector<1x10xf32>
    %362 = vector.broadcast %361 : vector<1x10xf32> to vector<16x10xf32>
    %363 = arith.addf %360, %362 : vector<16x10xf32>
    %cst_62 = arith.constant dense<0xFF800000> : vector<16xf32>
    %364 = vector.multi_reduction <maximumf>, %363, %cst_62 [1] : vector<16x10xf32> to vector<16xf32>
    %365 = vector.shape_cast %364 : vector<16xf32> to vector<16x1xf32>
    %366 = vector.broadcast %365 : vector<16x1xf32> to vector<16x10xf32>
    %367 = arith.subf %363, %366 : vector<16x10xf32>
    %368 = math.exp %367 : vector<16x10xf32>
    %cst_63 = arith.constant dense<0.000000e+00> : vector<16xf32>
    %369 = vector.multi_reduction <add>, %368, %cst_63 [1] : vector<16x10xf32> to vector<16xf32>
    %370 = vector.shape_cast %369 : vector<16xf32> to vector<16x1xf32>
    %371 = math.log %370 : vector<16x1xf32>
    %372 = vector.broadcast %371 : vector<16x1xf32> to vector<16x10xf32>
    %373 = arith.subf %367, %372 : vector<16x10xf32>
    %c0_64 = arith.constant 0 : index
    %c0_65 = arith.constant 0 : index
    %374 = vector.load %arg9[%c0_64, %c0_65] : memref<16x10xf32, #tpu.memory_space<vmem>>, vector<16x10xf32>
    tpu.vector_store %arg9[%c0_64, %c0_65], %373 {strides = array<i32>} : memref<16x10xf32, #tpu.memory_space<vmem>>, vector<16x10xf32>,
    return
  }
}

</mosaic_0001>

<bundles_post_ra>
// kernel: tpu_custom_call.1
= control target key start
LH: loop header
LB: loop body
LE: loop exit
PB: predicated region body
PF: predicated region fallthrough
CT: control target
= control target key end

     0   :  { %v3007_v1 = vmov 0.0   ;;  %vm134_vm0 = vcmask 1042432   ;;  %vm109_vm1 = vcmask 179200   ;;  %vm3008_vm2 = vmmov 0   ;;  %s3666_s0 = inlined_call_operand.vmem [shape: bf16[128,22], index: 0, kind: input, shape index: {}]   ;;  %s3667_s1 = inlined_call_operand.vmem [shape: bf16[22,128], index: 1, kind: input, shape index: {}]   ;;  %s3668_s2 = inlined_call_operand.vmem [shape: bf16[32,128], index: 2, kind: input, shape index: {}]   ;;  %s3669_s3 = inlined_call_operand.vmem [shape: f32[1,128], index: 3, kind: input, shape index: {}]   ;;  %s3670_s4 = inlined_call_operand.vmem [shape: bf16[32,128], index: 4, kind: input, shape index: {}]   ;;  %s3671_s5 = inlined_call_operand.vmem [shape: bf16[32,128], index: 5, kind: input, shape index: {}]   ;;  %s3672_s6 = inlined_call_operand.vmem [shape: f32[1,128], index: 6, kind: input, shape index: {}]   ;;  %s3673_s7 = inlined_call_operand.vmem [shape: bf16[32,10], index: 7, kind: input, shape index: {}]   ;;  %s3674_s8 = inlined_call_operand.vmem [shape: f32[1,10], index: 8, kind: input, shape index: {}]   ;;  %s3675_s9 = inlined_call_operand.hbm [shape: f32[16,10], index: 9, kind: output, shape index: {}]  }
   0x1   :  { %v2695_v0 = vld [vmem:[%s3667_s1 + $0x8] ss:$0 sps:$4 sm:$0x77]   ;;  %2486 = vmatprep.subr.bf16.mxu1 %v3007_v1  ;;  %v2697_v4 = vld [vmem:[%s3667_s1] sm:$0xff]   ;;  %2490 = vmatprep.mubr.msk.bf16.mxu1 %vm3008_vm2, %v3007_v1  ;;  %v3009_v8 = vmov 0  }
   0x2   :  { %v3072_v2 = vld [vmem:[%s3668_s2 + $0x8] sm:$0xff]   ;;  %2686 = vmatprep.subr.msk.bf16.mxu0 %vm134_vm0, %v2695_v0  ;;  %v136_v3 = vsel %vm134_vm0, %v2695_v0, 0  ;;  %v3081_v5 = vld [vmem:[%s3668_s2] sm:$0xff]  }
   0x3   :  { %2487 = vmatpush3.bf16.msra.mxu1 %v3072_v2  ;;  %2467 = vmatpush3.bf16.msra.mxu0 %v136_v3  ;;  %v2699_v6 = vld [vmem:[%s3666_s0] sm:$0xff]   ;;  %v2700_v7 = vld [vmem:[%s3666_s0 + $0x8] sm:$0xff]  }
   0x4   :  { %2488 = vmatprep.subr.bf16.mxu1 %v3007_v1  ;;  %2468 = vmatprep.subr.bf16.mxu0 %v2697_v4 }
   0x5   :  { %2470 = vmatprep.mubr.msk.bf16.mxu0 %vm109_vm1, %v2699_v6 }
   0x7   :  { %2489 = vmatpush3.bf16.msra.mxu1 %v3081_v5  ;;  %2469 = vmatpush3.bf16.msra.mxu0 %v2697_v4 }
   0x8   :  { %2494 = vmatprep.subr.bf16.mxu1 %v3007_v1  ;;  %2518 = vmatprep.subr.bf16.mxu0 %v3007_v1 }
   0xa   :  { %2491 = vmatmul.mubr.bf16.vlgmr.msra.gmra.mxu1 %v3009_v8  ;;  %2471 = vmatmul.mubr.msk.bf16.vlgmr.msra.gmra.mxu0 %vm109_vm1, %v2700_v7 }
   0xb   :  { %2498 = vmatprep.mubr.msk.bf16.mxu1 %vm3008_vm2, %v3007_v1 }
   0xc   :  { %14 = vsyncpa [#allocation3], 0  ;;  %v3105_v11 = vld [vmem:[%s3669_s3] ss:$0 sm:$0xff]  ;;  %s3010_s22 = smov 32   ;;  %v3124_v42 = vld [vmem:[%s3671_s5 + $0x8] sm:$0xff]  }
   0xd   :  { %2495 = vmatpush3.bf16.msra.mxu1 %v3124_v42  ;;  %v3130_v43 = vld [vmem:[%s3671_s5] sm:$0xff]   ;;  %2519 = vmatpush3.bf16.msra.mxu0 %v3124_v42  ;;  %v3140_v45 = vld [vmem:[%s3670_s4 + $0x8] sm:$0xff]   ;;  %s3011_s10 = smov 64   ;;  %vm260_vm3 = vcmask 261120   ;;  %vm2254_vm4 = vcmask 80896  }
   0xe   :  { %2496 = vmatprep.subr.bf16.mxu1 %v3007_v1  ;;  %2520 = vmatprep.subr.bf16.mxu0 %v3007_v1  ;;  %v3151_v47 = vld [vmem:[%s3670_s4] sm:$0xff]  }
   0xf   :  { %v3176_v58 = vld [vmem:[%s3672_s6] ss:$0 sm:$0xff] }
  0x11   :  { %2497 = vmatpush3.bf16.msra.mxu1 %v3130_v43  ;;  %2521 = vmatpush3.bf16.msra.mxu0 %v3130_v43 }
  0x12   :  { %2502 = vmatprep.subr.bf16.mxu1 %v3007_v1  ;;  %2534 = vmatprep.subr.bf16.mxu0 %v3007_v1 }
  0x14   :  { %2499 = vmatmul.mubr.bf16.vlgmr.msra.gmra.mxu1 %v3009_v8 }
  0x15   :  { %2503 = vmatpush3.bf16.msra.mxu1 %v3140_v45  ;;  %2506 = vmatprep.mubr.msk.bf16.mxu1 %vm3008_vm2, %v3007_v1 }
  0x16   :  { %2504 = vmatprep.subr.bf16.mxu1 %v3007_v1 }
  0x19   :  { %2505 = vmatpush3.bf16.msra.mxu1 %v3151_v47 }
  0x1a   :  { %2510 = vmatprep.subr.bf16.mxu1 %v3007_v1 }
  0xca   :  { %v298_v9 = vpop.f32.mrf.mxu1  ;;  %v3100_v10 = vpop.f32.mrf.mxu0 }
  0xcb   :  { %v181_v4 = vadd.f32 %v3100_v10, %v3105_v11 }
  0xcc   :  { %v2492_v12 = vpop.f32.mrf.mxu1  ;;  %v172_v13 = vpop.f32.mrf.mxu0 }
  0xcd   :  { %v173_v14 = vadd.f32 %v3105_v11, %v172_v13 }
  0xce   :  { %v301_v15 = vpop.f32.mrf.mxu1  ;;  %v3108_v16 = vpop.f32.mrf.mxu0 }
  0xcf   :  { %v305_v17 = vadd.f32 %v298_v9, %v173_v14  ;;  %v184_v12 = vadd.f32 %v3108_v16, %v3105_v11 }
  0xd0   :  { %v2493_v18 = vpop.f32.mrf.mxu1  ;;  %v175_v19 = vpop.f32.mrf.mxu0 }
  0xd1   :  { %2713 = vtanh.f32 %v305_v17  ;;  %v176_v20 = vadd.f32 %v3105_v11, %v175_v19  ;;  %v2318_v24 = vmul.f32 -1.442695, %v305_v17 }
  0xd3   :  { %v306_v21 = vadd.f32 %v301_v15, %v176_v20 }
  0xd4   :  { %v402_v53 = vpop.f32.mrf.mxu1 }
  0xd5   :  { %2715 = vtanh.f32 %v306_v21  ;;  %v2319_v25 = vmul.f32 -1.442695, %v306_v21 }
  0xd6   :  { %2717 = vpow2.f32 %v2318_v24  ;;  %v2500_v54 = vpop.f32.mrf.mxu1 }
  0xd7   :  { %2719 = vpow2.f32 %v2319_v25 }
  0xd8   :  { %v405_v55 = vpop.f32.mrf.mxu1 }
  0xda   :  { %v2501_v56 = vpop.f32.mrf.mxu1 }
  0xde   :  { %v2714_v22 = vpop.eup %2713 }
  0xdf   :  { %325 = vrot.lane.b32.xlu0 %v2714_v22, %s3010_s22 }
  0xe2   :  { %v2716_v23 = vpop.eup %2715 }
  0xe3   :  { %327 = vrot.lane.b32.xlu0 %v2716_v23, %s3010_s22  ;;  %v2718_v26 = vpop.eup %2717 }
  0xe4   :  { %v313_v27 = vadd.f32 1.0, %v2718_v26  ;;  %v2720_v28 = vpop.eup %2719 }
  0xe5   :  { %v314_v29 = vadd.f32 1.0, %v2720_v28 }
  0xe6   :  { %2721 = vrcp.f32 %v313_v27 }
  0xe7   :  { %2723 = vrcp.f32 %v314_v29 }
  0xf3   :  { %v2722_v30 = vpop.eup %2721 }
  0xf4   :  { %v2724_v33 = vpop.eup %2723  ;;  %v321_v36 = vmul.f32 0.0, %v2722_v30 }
  0xf5   :  { %v322_v39 = vmul.f32 0.0, %v2724_v33 }
 0x151   :  { %v326_v31 = vpop.permute.xlu0 %325 }
 0x152   :  { %v331_v32 = vmul.f32 %v2722_v30, %v326_v31 }
 0x154   :  { %335 = vrot.lane.b32.xlu1 %v331_v32, %s3010_s22 }
 0x155   :  { %v328_v34 = vpop.permute.xlu0 %327 }
 0x156   :  { %v332_v35 = vmul.f32 %v2724_v33, %v328_v34 }
 0x158   :  { %337 = vrot.lane.b32.xlu1 %v332_v35, %s3010_s22 }
 0x1c6   :  { %v336_v37 = vpop.permute.xlu1 %335 }
 0x1c7   :  { %v3115_v38 = vadd.f32 %v336_v37, %v321_v36 }
 0x1c9   :  { %2725 = vtanh.f32 %v3115_v38 }
 0x1ca   :  { %v338_v40 = vpop.permute.xlu1 %337 }
 0x1cb   :  { %v3118_v41 = vadd.f32 %v338_v40, %v322_v39 }
 0x1cd   :  { %2727 = vtanh.f32 %v3118_v41 }
 0x1d6   :  { %v2726_v44 = vpop.eup %2725 }
 0x1d7   :  { %347 = vrot.lane.b32.xlu0 %v2726_v44, %s3010_s22 }
 0x1da   :  { %v2728_v46 = vpop.eup %2727 }
 0x1db   :  { %349 = vrot.lane.b32.xlu1 %v2728_v46, %s3010_s22 }
 0x249   :  { %v348_v48 = vpop.permute.xlu0 %347 }
 0x24a   :  { %v353_v50 = vmul.f32 %v2722_v30, %v348_v48 }
 0x24d   :  { %v350_v49 = vpop.permute.xlu1 %349 }
 0x24e   :  { %v354_v51 = vmul.f32 %v2724_v33, %v350_v49 }
 0x250   :  { %v355_v52 = vpack.c.bf16 %v354_v51, %v353_v50 }
 0x252   :  { %410 = vrot.lane.b32.xlu0 %v355_v52, %s3011_s10 }
 0x2c4   :  { %v411_v57 = vpop.permute.xlu0 %410 }
 0x2c5   :  { %2507 = vmatmul.mubr.msk.bf16.vlgmr.msra.gmra.mxu1 %vm260_vm3, %v411_v57 }
 0x2c6   :  { %2511 = vmatpush3.bf16.msra.mxu1 %v3072_v2  ;;  %2514 = vmatprep.mubr.msk.bf16.mxu1 %vm3008_vm2, %v3007_v1 }
 0x2c7   :  { %2512 = vmatprep.subr.bf16.mxu1 %v3007_v1 }
 0x2ca   :  { %2513 = vmatpush3.bf16.msra.mxu1 %v3081_v5 }
 0x2cb   :  { %2526 = vmatprep.subr.bf16.mxu1 %v3007_v1 }
 0x2cd   :  { %2515 = vmatmul.mubr.msk.bf16.vlgmr.msra.gmra.mxu1 %vm260_vm3, %v411_v57 }
 0x2ce   :  { %2527 = vmatpush3.bf16.msra.mxu1 %v3140_v45  ;;  %2530 = vmatprep.mubr.msk.bf16.mxu1 %vm3008_vm2, %v3007_v1 }
 0x2cf   :  { %2528 = vmatprep.subr.bf16.mxu1 %v3007_v1 }
 0x2d2   :  { %2529 = vmatpush3.bf16.msra.mxu1 %v3151_v47 }
 0x2d3   :  { %2542 = vmatprep.subr.bf16.mxu1 %v3007_v1 }
 0x385   :  { %v461_v59 = vpop.f32.mrf.mxu1 }
 0x386   :  { %v462_v60 = vadd.f32 %v461_v59, %v402_v53 }
 0x387   :  { %v2508_v61 = vpop.f32.mrf.mxu1 }
 0x388   :  { %v474_v62 = vadd.f32 %v3176_v58, %v462_v60 }
 0x389   :  { %v464_v63 = vpop.f32.mrf.mxu1 }
 0x38a   :  { %2729 = vtanh.f32 %v474_v62  ;;  %v465_v0 = vadd.f32 %v464_v63, %v405_v55  ;;  %v2326_v20 = vmul.f32 -1.442695, %v474_v62  ;;  %v2706_v63 = vld [vmem:[%s3666_s0 + $0x18] sm:$0xff]  }
 0x38b   :  { %v2509_v3 = vpop.f32.mrf.mxu1 }
 0x38c   :  { %v475_v6 = vadd.f32 %v3176_v58, %v465_v0 }
 0x38d   :  { %v558_v7 = vpop.f32.mrf.mxu1 }
 0x38e   :  { %2731 = vtanh.f32 %v475_v6  ;;  %v565_v8 = vadd.f32 %v558_v7, %v181_v4  ;;  %v2327_v16 = vmul.f32 -1.442695, %v475_v6  ;;  %v2708_v4 = vld [vmem:[%s3666_s0 + $0x28] sm:$0xff]   ;;  %v2709_v7 = vld [vmem:[%s3666_s0 + $0x30] sm:$0xff]  }
 0x38f   :  { %v2516_v9 = vpop.f32.mrf.mxu1 }
 0x390   :  { %2733 = vtanh.f32 %v565_v8  ;;  %v2329_v21 = vmul.f32 -1.442695, %v565_v8  ;;  %v2710_v8 = vld [vmem:[%s3666_s0 + $0x38] sm:$0xff]  }
 0x391   :  { %v561_v13 = vpop.f32.mrf.mxu1 }
 0x392   :  { %v566_v14 = vadd.f32 %v561_v13, %v184_v12 }
 0x393   :  { %v2517_v15 = vpop.f32.mrf.mxu1 }
 0x394   :  { %2735 = vtanh.f32 %v566_v14  ;;  %v2330_v22 = vmul.f32 -1.442695, %v566_v14 }
 0x395   :  { %2737 = vpow2.f32 %v2326_v20 }
 0x396   :  { %2739 = vpow2.f32 %v2327_v16 }
 0x397   :  { %v2730_v17 = vpop.eup %2729  ;;  %2741 = vpow2.f32 %v2329_v21 }
 0x398   :  { %494 = vrot.lane.b32.xlu1 %v2730_v17, %s3010_s22  ;;  %2743 = vpow2.f32 %v2330_v22 }
 0x39b   :  { %v2732_v18 = vpop.eup %2731 }
 0x39c   :  { %496 = vrot.lane.b32.xlu0 %v2732_v18, %s3010_s22 }
 0x39d   :  { %v2734_v10 = vpop.eup %2733 }
 0x39e   :  { %585 = vrot.lane.b32.xlu1 %v2734_v10, %s3010_s22 }
 0x3a1   :  { %v2736_v19 = vpop.eup %2735 }
 0x3a2   :  { %587 = vrot.lane.b32.xlu0 %v2736_v19, %s3010_s22  ;;  %v2738_v23 = vpop.eup %2737 }
 0x3a3   :  { %v482_v24 = vadd.f32 1.0, %v2738_v23  ;;  %v2740_v25 = vpop.eup %2739 }
 0x3a4   :  { %v2742_v26 = vpop.eup %2741  ;;  %v483_v27 = vadd.f32 1.0, %v2740_v25 }
 0x3a5   :  { %2745 = vrcp.f32 %v482_v24  ;;  %v2744_v28 = vpop.eup %2743  ;;  %v573_v29 = vadd.f32 1.0, %v2742_v26 }
 0x3a6   :  { %2747 = vrcp.f32 %v483_v27  ;;  %v574_v30 = vadd.f32 1.0, %v2744_v28 }
 0x3a7   :  { %2749 = vrcp.f32 %v573_v29 }
 0x3a8   :  { %2751 = vrcp.f32 %v574_v30 }
 0x3b2   :  { %v2746_v31 = vpop.eup %2745 }
 0x3b3   :  { %v2748_v34 = vpop.eup %2747  ;;  %v490_v49 = vmul.f32 0.0, %v2746_v31 }
 0x3b4   :  { %v2750_v37 = vpop.eup %2749  ;;  %v491_v52 = vmul.f32 0.0, %v2748_v34 }
 0x3b5   :  { %v2752_v44 = vpop.eup %2751  ;;  %v581_v55 = vmul.f32 %v2750_v37, %v3115_v38  ;;  %v2705_v38 = vld [vmem:[%s3666_s0 + $0x10] sm:$0xff]  }
 0x3b6   :  { %v582_v59 = vmul.f32 %v2752_v44, %v3118_v41  ;;  %v2707_v41 = vld [vmem:[%s3666_s0 + $0x20] sm:$0xff]   ;;  %2474 = vmatprep.mubr.msk.bf16.mxu0 %vm109_vm1, %v2705_v38 }
 0x3b7   :  { %2475 = vmatmul.mubr.msk.bf16.gmra.mxu0 %vm109_vm1, %v2706_v63 }
 0x3b8   :  { %2478 = vmatprep.mubr.msk.bf16.mxu0 %vm109_vm1, %v2707_v41 }
 0x3bf   :  { %2479 = vmatmul.mubr.msk.bf16.gmra.mxu0 %vm109_vm1, %v2708_v4 }
 0x3c0   :  { %2482 = vmatprep.mubr.msk.bf16.mxu0 %vm109_vm1, %v2709_v7 }
 0x3c7   :  { %2483 = vmatmul.mubr.msk.bf16.gmra.mxu0 %vm109_vm1, %v2710_v8 }
 0x3c8   :  { %2522 = vmatprep.mubr.msk.bf16.mxu0 %vm3008_vm2, %v3007_v1 }
 0x40a   :  { %v495_v32 = vpop.permute.xlu1 %494 }
 0x40b   :  { %v500_v33 = vmul.f32 %v2746_v31, %v495_v32 }
 0x40d   :  { %504 = vrot.lane.b32.xlu1 %v500_v33, %s3010_s22 }
 0x40e   :  { %v497_v35 = vpop.permute.xlu0 %496 }
 0x40f   :  { %v501_v36 = vmul.f32 %v2748_v34, %v497_v35 }
 0x410   :  { %v586_v39 = vpop.permute.xlu1 %585 }
 0x411   :  { %506 = vrot.lane.b32.xlu0 %v501_v36, %s3010_s22  ;;  %v591_v40 = vmul.f32 %v2750_v37, %v586_v39 }
 0x413   :  { %595 = vrot.lane.b32.xlu1 %v591_v40, %s3010_s22 }
 0x414   :  { %v588_v46 = vpop.permute.xlu0 %587 }
 0x415   :  { %v592_v48 = vmul.f32 %v2752_v44, %v588_v46 }
 0x417   :  { %597 = vrot.lane.b32.xlu0 %v592_v48, %s3010_s22 }
 0x477   :  { %v3259_v22 = vpop.f32.mrf.mxu0 }
 0x479   :  { %v188_v23 = vpop.f32.mrf.mxu0 }
 0x47b   :  { %v3261_v24 = vpop.f32.mrf.mxu0 }
 0x47d   :  { %v191_v25 = vpop.f32.mrf.mxu0 }
 0x47f   :  { %v505_v50 = vpop.permute.xlu1 %504  ;;  %v3263_v26 = vpop.f32.mrf.mxu0 }
 0x480   :  { %v3192_v51 = vadd.f32 %v505_v50, %v490_v49 }
 0x481   :  { %v3265_v27 = vpop.f32.mrf.mxu0 }
 0x482   :  { %2753 = vtanh.f32 %v3192_v51 }
 0x483   :  { %v507_v53 = vpop.permute.xlu0 %506  ;;  %v3267_v28 = vpop.f32.mrf.mxu0 }
 0x484   :  { %v3195_v54 = vadd.f32 %v507_v53, %v491_v52 }
 0x485   :  { %v596_v56 = vpop.permute.xlu1 %595  ;;  %v3269_v29 = vpop.f32.mrf.mxu0 }
 0x486   :  { %2755 = vtanh.f32 %v3195_v54  ;;  %v3199_v57 = vadd.f32 %v596_v56, %v581_v55 }
 0x487   :  { %v3271_v30 = vpop.f32.mrf.mxu0 }
 0x488   :  { %2757 = vtanh.f32 %v3199_v57 }
 0x489   :  { %v598_v60 = vpop.permute.xlu0 %597 }
 0x48a   :  { %v3203_v61 = vadd.f32 %v598_v60, %v582_v59  ;;  %v192_v60 = vadd.f32 %v3105_v11, %v191_v25 }
 0x48c   :  { %2759 = vtanh.f32 %v3203_v61 }
 0x48f   :  { %v2754_v62 = vpop.eup %2753 }
 0x490   :  { %516 = vrot.lane.b32.xlu1 %v2754_v62, %s3010_s22 }
 0x493   :  { %v2756_v0 = vpop.eup %2755 }
 0x494   :  { %518 = vrot.lane.b32.xlu0 %v2756_v0, %s3010_s22 }
 0x495   :  { %v2758_v3 = vpop.eup %2757 }
 0x496   :  { %607 = vrot.lane.b32.xlu1 %v2758_v3, %s3010_s22 }
 0x499   :  { %v2760_v6 = vpop.eup %2759 }
 0x49a   :  { %609 = vrot.lane.b32.xlu0 %v2760_v6, %s3010_s22 }
 0x502   :  { %v517_v9 = vpop.permute.xlu1 %516 }
 0x503   :  { %v522_v13 = vmul.f32 %v2746_v31, %v517_v9  ;;  %v3273_v31 = vpop.f32.mrf.mxu0 }
 0x505   :  { %v3275_v32 = vpop.f32.mrf.mxu0 }
 0x506   :  { %v519_v12 = vpop.permute.xlu0 %518 }
 0x507   :  { %v523_v14 = vmul.f32 %v2748_v34, %v519_v12  ;;  %v3277_v33 = vpop.f32.mrf.mxu0 }
 0x508   :  { %v608_v17 = vpop.permute.xlu1 %607 }
 0x509   :  { %v616_v15 = vpack.c.bf16 %v523_v14, %v522_v13  ;;  %v613_v10 = vmul.f32 %v2750_v37, %v608_v17 }
 0x50b   :  { %618 = vrot.lane.b32.xlu1 %v616_v15, %s3011_s10 }
 0x50c   :  { %v610_v18 = vpop.permute.xlu0 %609 }
 0x50d   :  { %v614_v19 = vmul.f32 %v2752_v44, %v610_v18  ;;  %v189_v44 = vadd.f32 %v3105_v11, %v188_v23 }
 0x50f   :  { %v615_v20 = vpack.c.bf16 %v614_v19, %v613_v10 }
 0x511   :  { %665 = vrot.lane.b32.xlu0 %v615_v20, %s3011_s10 }
 0x57d   :  { %v619_v16 = vpop.permute.xlu1 %618 }
 0x57e   :  { %2523 = vmatmul.mubr.msk.bf16.vlgmr.msra.gmra.mxu0 %vm260_vm3, %v619_v16 }
 0x57f   :  { %2535 = vmatpush3.bf16.msra.mxu0 %v3072_v2  ;;  %2538 = vmatprep.mubr.msk.bf16.mxu0 %vm3008_vm2, %v3007_v1 }
 0x580   :  { %2536 = vmatprep.subr.bf16.mxu0 %v3007_v1 }
 0x583   :  { %2537 = vmatpush3.bf16.msra.mxu0 %v3081_v5  ;;  %v666_v21 = vpop.permute.xlu0 %665 }
 0x584   :  { %2531 = vmatmul.mubr.msk.bf16.vlgmr.msra.gmra.mxu1 %vm260_vm3, %v666_v21  ;;  %2550 = vmatprep.subr.bf16.mxu0 %v3007_v1 }
 0x585   :  { %2543 = vmatpush3.bf16.msra.mxu1 %v3124_v42  ;;  %2546 = vmatprep.mubr.msk.bf16.mxu1 %vm3008_vm2, %v3007_v1 }
 0x586   :  { %2539 = vmatmul.mubr.msk.bf16.vlgmr.msra.gmra.mxu0 %vm260_vm3, %v666_v21  ;;  %2544 = vmatprep.subr.bf16.mxu1 %v3007_v1 }
 0x587   :  { %2551 = vmatpush3.bf16.msra.mxu0 %v3140_v45  ;;  %2554 = vmatprep.mubr.msk.bf16.mxu0 %vm3008_vm2, %v3007_v1 }
 0x588   :  { %2552 = vmatprep.subr.bf16.mxu0 %v3007_v1 }
 0x589   :  { %2545 = vmatpush3.bf16.msra.mxu1 %v3130_v43 }
 0x58a   :  { %2558 = vmatprep.subr.bf16.mxu1 %v3007_v1 }
 0x58b   :  { %2553 = vmatpush3.bf16.msra.mxu0 %v3151_v47 }
 0x58c   :  { %2566 = vmatprep.subr.bf16.mxu0 %v3007_v1 }
 0x63e   :  { %v657_v34 = vpop.f32.mrf.mxu0 }
 0x640   :  { %v2524_v35 = vpop.f32.mrf.mxu0 }
 0x642   :  { %v660_v36 = vpop.f32.mrf.mxu0 }
 0x644   :  { %v2525_v37 = vpop.f32.mrf.mxu0  ;;  %v704_v39 = vpop.f32.mrf.mxu1 }
 0x645   :  { %v705_v40 = vadd.f32 %v704_v39, %v657_v34 }
 0x646   :  { %v2532_v46 = vpop.f32.mrf.mxu1  ;;  %v795_v48 = vpop.f32.mrf.mxu0 }
 0x647   :  { %v711_v49 = vadd.f32 %v3176_v58, %v705_v40  ;;  %v802_v50 = vadd.f32 %v795_v48, %v189_v44 }
 0x648   :  { %v707_v52 = vpop.f32.mrf.mxu1  ;;  %v2540_v53 = vpop.f32.mrf.mxu0 }
 0x649   :  { %2761 = vtanh.f32 %v711_v49  ;;  %v708_v55 = vadd.f32 %v707_v52, %v660_v36  ;;  %v2333_v6 = vmul.f32 -1.442695, %v711_v49  ;;  %v2336_v7 = vmul.f32 -1.442695, %v802_v50 }
 0x64a   :  { %v2533_v56 = vpop.f32.mrf.mxu1  ;;  %v798_v59 = vpop.f32.mrf.mxu0  ;;  %2763 = vtanh.f32 %v802_v50 }
 0x64b   :  { %v712_v62 = vadd.f32 %v3176_v58, %v708_v55  ;;  %v803_v63 = vadd.f32 %v798_v59, %v192_v60 }
 0x64c   :  { %v2541_v38 = vpop.f32.mrf.mxu0 }
 0x64d   :  { %2765 = vtanh.f32 %v712_v62  ;;  %v2334_v8 = vmul.f32 -1.442695, %v712_v62  ;;  %v2337_v9 = vmul.f32 -1.442695, %v803_v63 }
 0x64e   :  { %2767 = vtanh.f32 %v803_v63 }
 0x64f   :  { %2769 = vpow2.f32 %v2333_v6 }
 0x650   :  { %2771 = vpow2.f32 %v2336_v7 }
 0x651   :  { %2773 = vpow2.f32 %v2334_v8 }
 0x652   :  { %2775 = vpow2.f32 %v2337_v9 }
 0x656   :  { %v2762_v41 = vpop.eup %2761 }
 0x657   :  { %731 = vrot.lane.b32.xlu1 %v2762_v41, %s3010_s22  ;;  %v2764_v0 = vpop.eup %2763 }
 0x65a   :  { %v2766_v3 = vpop.eup %2765 }
 0x65b   :  { %822 = vrot.lane.b32.xlu1 %v2764_v0, %s3010_s22  ;;  %733 = vrot.lane.b32.xlu0 %v2766_v3, %s3010_s22  ;;  %v2768_v4 = vpop.eup %2767 }
 0x65c   :  { %v2770_v12 = vpop.eup %2769 }
 0x65d   :  { %v2772_v13 = vpop.eup %2771  ;;  %v719_v14 = vadd.f32 1.0, %v2770_v12 }
 0x65e   :  { %v2774_v15 = vpop.eup %2773  ;;  %v810_v17 = vadd.f32 1.0, %v2772_v13 }
 0x65f   :  { %824 = vrot.lane.b32.xlu0 %v2768_v4, %s3010_s22  ;;  %2777 = vrcp.f32 %v719_v14  ;;  %v720_v18 = vadd.f32 1.0, %v2774_v15  ;;  %v2776_v10 = vpop.eup %2775 }
 0x660   :  { %2779 = vrcp.f32 %v810_v17  ;;  %v811_v19 = vadd.f32 1.0, %v2776_v10 }
 0x661   :  { %2781 = vrcp.f32 %v720_v18 }
 0x662   :  { %2783 = vrcp.f32 %v811_v19 }
 0x66c   :  { %v2778_v20 = vpop.eup %2777 }
 0x66d   :  { %v2780_v23 = vpop.eup %2779  ;;  %v727_v46 = vmul.f32 %v2778_v20, %v3192_v51 }
 0x66e   :  { %v2782_v25 = vpop.eup %2781  ;;  %v818_v50 = vmul.f32 %v2780_v23, %v3199_v57 }
 0x66f   :  { %v2784_v39 = vpop.eup %2783  ;;  %v728_v52 = vmul.f32 %v2782_v25, %v3195_v54 }
 0x670   :  { %v819_v60 = vmul.f32 %v2784_v39, %v3203_v61 }
 0x6c9   :  { %v732_v16 = vpop.permute.xlu1 %731 }
 0x6ca   :  { %v737_v21 = vmul.f32 %v2778_v20, %v732_v16 }
 0x6cc   :  { %741 = vrot.lane.b32.xlu1 %v737_v21, %s3010_s22 }
 0x6cd   :  { %v823_v34 = vpop.permute.xlu1 %822  ;;  %v734_v35 = vpop.permute.xlu0 %733 }
 0x6ce   :  { %v828_v36 = vmul.f32 %v2780_v23, %v823_v34  ;;  %v738_v37 = vmul.f32 %v2782_v25, %v734_v35 }
 0x6d0   :  { %832 = vrot.lane.b32.xlu1 %v828_v36, %s3010_s22  ;;  %743 = vrot.lane.b32.xlu0 %v738_v37, %s3010_s22  ;;  %v200_v37 = vadd.f32 %v3261_v24, %v3105_v11 }
 0x6d1   :  { %v825_v40 = vpop.permute.xlu0 %824 }
 0x6d2   :  { %v829_v44 = vmul.f32 %v2784_v39, %v825_v40 }
 0x6d4   :  { %834 = vrot.lane.b32.xlu0 %v829_v44, %s3010_s22 }
 0x73e   :  { %v742_v48 = vpop.permute.xlu1 %741 }
 0x73f   :  { %v3292_v49 = vadd.f32 %v742_v48, %v727_v46 }
 0x741   :  { %2785 = vtanh.f32 %v3292_v49 }
 0x742   :  { %v833_v53 = vpop.permute.xlu1 %832  ;;  %v744_v55 = vpop.permute.xlu0 %743 }
 0x743   :  { %v3297_v56 = vadd.f32 %v833_v53, %v818_v50  ;;  %v3299_v59 = vadd.f32 %v744_v55, %v728_v52 }
 0x745   :  { %2787 = vtanh.f32 %v3297_v56 }
 0x746   :  { %2789 = vtanh.f32 %v3299_v59  ;;  %v835_v51 = vpop.permute.xlu0 %834 }
 0x747   :  { %v3304_v62 = vadd.f32 %v835_v51, %v819_v60 }
 0x749   :  { %2791 = vtanh.f32 %v3304_v62 }
 0x74e   :  { %v2786_v57 = vpop.eup %2785 }
 0x74f   :  { %753 = vrot.lane.b32.xlu1 %v2786_v57, %s3010_s22 }
 0x752   :  { %v2788_v54 = vpop.eup %2787 }
 0x753   :  { %v2790_v38 = vpop.eup %2789  ;;  %844 = vrot.lane.b32.xlu1 %v2788_v54, %s3010_s22 }
 0x754   :  { %755 = vrot.lane.b32.xlu0 %v2790_v38, %s3010_s22 }
 0x756   :  { %v2792_v63 = vpop.eup %2791 }
 0x758   :  { %846 = vrot.lane.b32.xlu0 %v2792_v63, %s3010_s22 }
 0x7c1   :  { %v754_v61 = vpop.permute.xlu1 %753 }
 0x7c2   :  { %v759_v0 = vmul.f32 %v2778_v20, %v754_v61  ;;  %v197_v20 = vadd.f32 %v3259_v22, %v3105_v11 }
 0x7c5   :  { %v845_v4 = vpop.permute.xlu1 %844 }
 0x7c6   :  { %v756_v41 = vpop.permute.xlu0 %755  ;;  %v850_v8 = vmul.f32 %v2780_v23, %v845_v4 }
 0x7c7   :  { %v760_v3 = vmul.f32 %v2782_v25, %v756_v41 }
 0x7c9   :  { %v853_v6 = vpack.c.bf16 %v760_v3, %v759_v0 }
 0x7ca   :  { %v847_v7 = vpop.permute.xlu0 %846 }
 0x7cb   :  { %v851_v9 = vmul.f32 %v2784_v39, %v847_v7  ;;  %855 = vrot.lane.b32.xlu1 %v853_v6, %s3011_s10 }
 0x7cd   :  { %v852_v12 = vpack.c.bf16 %v851_v9, %v850_v8 }
 0x7cf   :  { %902 = vrot.lane.b32.xlu0 %v852_v12, %s3011_s10 }
 0x83d   :  { %v856_v13 = vpop.permute.xlu1 %855 }
 0x83e   :  { %2547 = vmatmul.mubr.msk.bf16.vlgmr.msra.gmra.mxu1 %vm260_vm3, %v856_v13 }
 0x83f   :  { %2559 = vmatpush3.bf16.msra.mxu1 %v3072_v2  ;;  %2562 = vmatprep.mubr.msk.bf16.mxu1 %vm3008_vm2, %v3007_v1 }
 0x840   :  { %2560 = vmatprep.subr.bf16.mxu1 %v3007_v1 }
 0x841   :  { %v903_v14 = vpop.permute.xlu0 %902 }
 0x842   :  { %2555 = vmatmul.mubr.msk.bf16.vlgmr.msra.gmra.mxu0 %vm260_vm3, %v903_v14 }
 0x843   :  { %2561 = vmatpush3.bf16.msra.mxu1 %v3081_v5  ;;  %2567 = vmatpush3.bf16.msra.mxu0 %v3124_v42 }
 0x844   :  { %2574 = vmatprep.subr.bf16.mxu1 %v3007_v1  ;;  %2568 = vmatprep.subr.bf16.mxu0 %v3007_v1 }
 0x845   :  { %2570 = vmatprep.mubr.msk.bf16.mxu0 %vm3008_vm2, %v3007_v1 }
 0x846   :  { %2563 = vmatmul.mubr.msk.bf16.vlgmr.msra.gmra.mxu1 %vm260_vm3, %v903_v14 }
 0x847   :  { %2575 = vmatpush3.bf16.msra.mxu1 %v3140_v45  ;;  %2569 = vmatpush3.bf16.msra.mxu0 %v3130_v43 }
 0x848   :  { %2576 = vmatprep.subr.bf16.mxu1 %v3007_v1  ;;  %2582 = vmatprep.subr.bf16.mxu0 %v3007_v1 }
 0x849   :  { %2578 = vmatprep.mubr.msk.bf16.mxu1 %vm3008_vm2, %v3007_v1 }
 0x84b   :  { %2577 = vmatpush3.bf16.msra.mxu1 %v3151_v47 }
 0x84c   :  { %2590 = vmatprep.subr.bf16.mxu1 %v3007_v1 }
 0x8fe   :  { %v894_v2 = vpop.f32.mrf.mxu1 }
 0x900   :  { %v2548_v5 = vpop.f32.mrf.mxu1 }
 0x902   :  { %v897_v15 = vpop.f32.mrf.mxu1  ;;  %v941_v17 = vpop.f32.mrf.mxu0 }
 0x903   :  { %v942_v18 = vadd.f32 %v941_v17, %v894_v2 }
 0x904   :  { %v2549_v10 = vpop.f32.mrf.mxu1  ;;  %v2556_v19 = vpop.f32.mrf.mxu0 }
 0x905   :  { %v948_v16 = vadd.f32 %v3176_v58, %v942_v18 }
 0x906   :  { %v944_v21 = vpop.f32.mrf.mxu0  ;;  %v1032_v23 = vpop.f32.mrf.mxu1 }
 0x907   :  { %2793 = vtanh.f32 %v948_v16  ;;  %v945_v25 = vadd.f32 %v944_v21, %v897_v15  ;;  %v1039_v34 = vadd.f32 %v1032_v23, %v197_v20  ;;  %v2340_v24 = vmul.f32 -1.442695, %v948_v16 }
 0x908   :  { %v2557_v35 = vpop.f32.mrf.mxu0  ;;  %v2564_v36 = vpop.f32.mrf.mxu1 }
 0x909   :  { %v949_v39 = vadd.f32 %v3176_v58, %v945_v25  ;;  %2795 = vtanh.f32 %v1039_v34  ;;  %v2343_v53 = vmul.f32 -1.442695, %v1039_v34 }
 0x90a   :  { %v1035_v40 = vpop.f32.mrf.mxu1 }
 0x90b   :  { %2797 = vtanh.f32 %v949_v39  ;;  %v1040_v44 = vadd.f32 %v1035_v40, %v200_v37  ;;  %v2341_v55 = vmul.f32 -1.442695, %v949_v39 }
 0x90c   :  { %v2565_v46 = vpop.f32.mrf.mxu1 }
 0x90d   :  { %2799 = vtanh.f32 %v1040_v44  ;;  %v2344_v60 = vmul.f32 -1.442695, %v1040_v44 }
 0x90e   :  { %2801 = vpow2.f32 %v2340_v24 }
 0x90f   :  { %2803 = vpow2.f32 %v2343_v53 }
 0x910   :  { %2805 = vpow2.f32 %v2341_v55  ;;  %v3374_v55 = vld [vmem:[%s3668_s2 + $0x8] sm:$0xff]  }
 0x911   :  { %2807 = vpow2.f32 %v2344_v60 }
 0x914   :  { %v2794_v22 = vpop.eup %2793 }
 0x915   :  { %968 = vrot.lane.b32.xlu1 %v2794_v22, %s3010_s22 }
 0x916   :  { %v2796_v48 = vpop.eup %2795 }
 0x918   :  { %v2798_v50 = vpop.eup %2797 }
 0x919   :  { %970 = vrot.lane.b32.xlu0 %v2798_v50, %s3010_s22  ;;  %1059 = vrot.lane.b32.xlu1 %v2796_v48, %s3010_s22 }
 0x91a   :  { %v2800_v52 = vpop.eup %2799 }
 0x91b   :  { %v2802_v51 = vpop.eup %2801 }
 0x91c   :  { %v2804_v57 = vpop.eup %2803  ;;  %v956_v54 = vadd.f32 1.0, %v2802_v51  ;;  %v3384_v51 = vld [vmem:[%s3668_s2] sm:$0xff]  }
 0x91d   :  { %1061 = vrot.lane.b32.xlu0 %v2800_v52, %s3010_s22  ;;  %v2806_v38 = vpop.eup %2805  ;;  %v1047_v63 = vadd.f32 1.0, %v2804_v57 }
 0x91e   :  { %2809 = vrcp.f32 %v956_v54  ;;  %v957_v61 = vadd.f32 1.0, %v2806_v38  ;;  %v2808_v41 = vpop.eup %2807 }
 0x91f   :  { %2811 = vrcp.f32 %v1047_v63  ;;  %v1048_v0 = vadd.f32 1.0, %v2808_v41 }
 0x920   :  { %2813 = vrcp.f32 %v957_v61 }
 0x921   :  { %2815 = vrcp.f32 %v1048_v0 }
 0x92b   :  { %v2810_v3 = vpop.eup %2809 }
 0x92c   :  { %v2812_v7 = vpop.eup %2811  ;;  %v964_v17 = vmul.f32 %v2810_v3, %v3292_v49 }
 0x92d   :  { %v2814_v8 = vpop.eup %2813  ;;  %v1055_v19 = vmul.f32 %v2812_v7, %v3297_v56 }
 0x92e   :  { %v2816_v2 = vpop.eup %2815  ;;  %v965_v20 = vmul.f32 %v2814_v8, %v3299_v59 }
 0x92f   :  { %v1056_v34 = vmul.f32 %v2816_v2, %v3304_v62 }
 0x987   :  { %v969_v4 = vpop.permute.xlu1 %968 }
 0x988   :  { %v974_v6 = vmul.f32 %v2810_v3, %v969_v4 }
 0x98a   :  { %978 = vrot.lane.b32.xlu1 %v974_v6, %s3010_s22 }
 0x98b   :  { %v971_v9 = vpop.permute.xlu0 %970  ;;  %v1060_v12 = vpop.permute.xlu1 %1059 }
 0x98c   :  { %v975_v13 = vmul.f32 %v2814_v8, %v971_v9  ;;  %v1065_v14 = vmul.f32 %v2812_v7, %v1060_v12 }
 0x98e   :  { %1069 = vrot.lane.b32.xlu1 %v1065_v14, %s3010_s22  ;;  %980 = vrot.lane.b32.xlu0 %v975_v13, %s3010_s22 }
 0x98f   :  { %v1062_v5 = vpop.permute.xlu0 %1061 }
 0x990   :  { %v1066_v15 = vmul.f32 %v2816_v2, %v1062_v5 }
 0x992   :  { %1071 = vrot.lane.b32.xlu0 %v1066_v15, %s3010_s22 }
 0x9fc   :  { %v979_v18 = vpop.permute.xlu1 %978 }
 0x9fd   :  { %v3349_v10 = vadd.f32 %v979_v18, %v964_v17 }
 0x9ff   :  { %2817 = vtanh.f32 %v3349_v10 }
 0xa00   :  { %v1070_v16 = vpop.permute.xlu1 %1069  ;;  %v981_v21 = vpop.permute.xlu0 %980 }
 0xa01   :  { %v3354_v23 = vadd.f32 %v1070_v16, %v1055_v19  ;;  %v3356_v25 = vadd.f32 %v981_v21, %v965_v20 }
 0xa03   :  { %2819 = vtanh.f32 %v3354_v23 }
 0xa04   :  { %2821 = vtanh.f32 %v3356_v25  ;;  %v1072_v49 = vpop.permute.xlu0 %1071 }
 0xa05   :  { %v3361_v35 = vadd.f32 %v1072_v49, %v1056_v34 }
 0xa07   :  { %2823 = vtanh.f32 %v3361_v35 }
 0xa0c   :  { %v2818_v56 = vpop.eup %2817 }
 0xa0d   :  { %990 = vrot.lane.b32.xlu1 %v2818_v56, %s3010_s22 }
 0xa10   :  { %v2820_v59 = vpop.eup %2819 }
 0xa11   :  { %v2822_v36 = vpop.eup %2821  ;;  %1081 = vrot.lane.b32.xlu1 %v2820_v59, %s3010_s22 }
 0xa12   :  { %992 = vrot.lane.b32.xlu0 %v2822_v36, %s3010_s22 }
 0xa14   :  { %v2824_v37 = vpop.eup %2823 }
 0xa16   :  { %1083 = vrot.lane.b32.xlu0 %v2824_v37, %s3010_s22 }
 0xa7f   :  { %v991_v62 = vpop.permute.xlu1 %990 }
 0xa80   :  { %v996_v40 = vmul.f32 %v2810_v3, %v991_v62 }
 0xa83   :  { %v1082_v46 = vpop.permute.xlu1 %1081 }
 0xa84   :  { %v993_v39 = vpop.permute.xlu0 %992  ;;  %v1087_v50 = vmul.f32 %v2812_v7, %v1082_v46 }
 0xa85   :  { %v997_v44 = vmul.f32 %v2814_v8, %v993_v39  ;;  %v208_v8 = vadd.f32 %v3105_v11, %v3269_v29 }
 0xa87   :  { %v1090_v22 = vpack.c.bf16 %v997_v44, %v996_v40 }
 0xa88   :  { %v1084_v48 = vpop.permute.xlu0 %1083 }
 0xa89   :  { %v1088_v52 = vmul.f32 %v2816_v2, %v1084_v48  ;;  %1092 = vrot.lane.b32.xlu1 %v1090_v22, %s3011_s10 }
 0xa8b   :  { %v1089_v24 = vpack.c.bf16 %v1088_v52, %v1087_v50 }
 0xa8d   :  { %1139 = vrot.lane.b32.xlu0 %v1089_v24, %s3011_s10 }
 0xafb   :  { %v1093_v53 = vpop.permute.xlu1 %1092 }
 0xafc   :  { %2571 = vmatmul.mubr.msk.bf16.vlgmr.msra.gmra.mxu0 %vm260_vm3, %v1093_v53 }
 0xafd   :  { %2583 = vmatpush3.bf16.msra.mxu0 %v3374_v55  ;;  %2586 = vmatprep.mubr.msk.bf16.mxu0 %vm3008_vm2, %v3007_v1 }
 0xafe   :  { %2584 = vmatprep.subr.bf16.mxu0 %v3007_v1 }
 0xaff   :  { %v1140_v60 = vpop.permute.xlu0 %1139 }
 0xb00   :  { %2579 = vmatmul.mubr.msk.bf16.vlgmr.msra.gmra.mxu1 %vm260_vm3, %v1140_v60 }
 0xb01   :  { %2585 = vmatpush3.bf16.msra.mxu0 %v3384_v51  ;;  %2591 = vmatpush3.bf16.msra.mxu1 %v3124_v42 }
 0xb02   :  { %2598 = vmatprep.subr.bf16.mxu0 %v3007_v1  ;;  %2592 = vmatprep.subr.bf16.mxu1 %v3007_v1 }
 0xb03   :  { %2594 = vmatprep.mubr.msk.bf16.mxu1 %vm3008_vm2, %v3007_v1 }
 0xb04   :  { %2587 = vmatmul.mubr.msk.bf16.vlgmr.msra.gmra.mxu0 %vm260_vm3, %v1140_v60 }
 0xb05   :  { %2599 = vmatpush3.bf16.msra.mxu0 %v3140_v45  ;;  %2593 = vmatpush3.bf16.msra.mxu1 %v3130_v43  ;;  %v205_v43 = vadd.f32 %v3105_v11, %v3265_v27 }
 0xb06   :  { %2600 = vmatprep.subr.bf16.mxu0 %v3007_v1  ;;  %2606 = vmatprep.subr.bf16.mxu1 %v3007_v1 }
 0xb07   :  { %2602 = vmatprep.mubr.msk.bf16.mxu0 %vm3008_vm2, %v3007_v1 }
 0xb09   :  { %2601 = vmatpush3.bf16.msra.mxu0 %v3151_v47 }
 0xb0a   :  { %2614 = vmatprep.subr.bf16.mxu0 %v3007_v1 }
 0xbbc   :  { %v1131_v42 = vpop.f32.mrf.mxu0 }
 0xbbe   :  { %v2572_v57 = vpop.f32.mrf.mxu0 }
 0xbc0   :  { %v1134_v54 = vpop.f32.mrf.mxu0  ;;  %v1178_v38 = vpop.f32.mrf.mxu1 }
 0xbc1   :  { %v1179_v63 = vadd.f32 %v1178_v38, %v1131_v42 }
 0xbc2   :  { %v2573_v61 = vpop.f32.mrf.mxu0  ;;  %v2580_v45 = vpop.f32.mrf.mxu1 }
 0xbc3   :  { %v1185_v41 = vadd.f32 %v3176_v58, %v1179_v63 }
 0xbc4   :  { %v1181_v0 = vpop.f32.mrf.mxu1  ;;  %v1269_v3 = vpop.f32.mrf.mxu0 }
 0xbc5   :  { %2825 = vtanh.f32 %v1185_v41  ;;  %v1182_v4 = vadd.f32 %v1181_v0, %v1134_v54  ;;  %v1276_v6 = vadd.f32 %v1269_v3, %v205_v43  ;;  %v2347_v11 = vmul.f32 -1.442695, %v1185_v41 }
 0xbc6   :  { %v2581_v47 = vpop.f32.mrf.mxu1  ;;  %v2588_v7 = vpop.f32.mrf.mxu0 }
 0xbc7   :  { %v1186_v9 = vadd.f32 %v3176_v58, %v1182_v4  ;;  %2827 = vtanh.f32 %v1276_v6  ;;  %v2350_v58 = vmul.f32 -1.442695, %v1276_v6 }
 0xbc8   :  { %v1272_v12 = vpop.f32.mrf.mxu0 }
 0xbc9   :  { %2829 = vtanh.f32 %v1186_v9  ;;  %v1277_v13 = vadd.f32 %v1272_v12, %v208_v8  ;;  %v2348_v29 = vmul.f32 -1.442695, %v1186_v9 }
 0xbca   :  { %v2589_v14 = vpop.f32.mrf.mxu0 }
 0xbcb   :  { %2831 = vtanh.f32 %v1277_v13  ;;  %v2351_v17 = vmul.f32 -1.442695, %v1277_v13 }
 0xbcc   :  { %2833 = vpow2.f32 %v2347_v11  ;;  %v3474_v11 = vld [vmem:[%s3670_s4] sm:$0xff]  }
 0xbcd   :  { %2835 = vpow2.f32 %v2350_v58 }
 0xbce   :  { %2837 = vpow2.f32 %v2348_v29 }
 0xbcf   :  { %2839 = vpow2.f32 %v2351_v17 }
 0xbd2   :  { %v2826_v27 = vpop.eup %2825 }
 0xbd3   :  { %1205 = vrot.lane.b32.xlu1 %v2826_v27, %s3010_s22 }
 0xbd4   :  { %v2828_v2 = vpop.eup %2827 }
 0xbd6   :  { %v2830_v5 = vpop.eup %2829 }
 0xbd7   :  { %1296 = vrot.lane.b32.xlu1 %v2828_v2, %s3010_s22  ;;  %1207 = vrot.lane.b32.xlu0 %v2830_v5, %s3010_s22  ;;  %v3447_v2 = vld [vmem:[%s3671_s5 + $0x8] sm:$0xff]  }
 0xbd8   :  { %v2832_v15 = vpop.eup %2831  ;;  %v3458_v5 = vld [vmem:[%s3670_s4 + $0x8] sm:$0xff]  }
 0xbd9   :  { %v2834_v18 = vpop.eup %2833 }
 0xbda   :  { %v2836_v19 = vpop.eup %2835  ;;  %v1193_v20 = vadd.f32 1.0, %v2834_v18 }
 0xbdb   :  { %1298 = vrot.lane.b32.xlu0 %v2832_v15, %s3010_s22  ;;  %v2838_v16 = vpop.eup %2837  ;;  %v1284_v21 = vadd.f32 1.0, %v2836_v19  ;;  %v3464_v15 = vld [vmem:[%s3671_s5] sm:$0xff]  }
 0xbdc   :  { %2841 = vrcp.f32 %v1193_v20  ;;  %v1194_v34 = vadd.f32 1.0, %v2838_v16  ;;  %v2840_v49 = vpop.eup %2839 }
 0xbdd   :  { %2843 = vrcp.f32 %v1284_v21  ;;  %v1285_v56 = vadd.f32 1.0, %v2840_v49  ;;  %v3481_v21 = vld [vmem:[%s3669_s3] ss:$0 sm:$0xff] }
 0xbde   :  { %2845 = vrcp.f32 %v1194_v34  ;;  %v213_v34 = vadd.f32 %v3481_v21, %v3263_v26  ;;  %v3488_v49 = vld [vmem:[%s3672_s6] ss:$0 sm:$0xff] }
 0xbdf   :  { %2847 = vrcp.f32 %v1285_v56 }
 0xbe9   :  { %v2842_v59 = vpop.eup %2841 }
 0xbea   :  { %v2844_v62 = vpop.eup %2843  ;;  %v1201_v24 = vmul.f32 %v2842_v59, %v3349_v10 }
 0xbeb   :  { %v2846_v39 = vpop.eup %2845  ;;  %v1292_v42 = vmul.f32 %v2844_v62, %v3354_v23 }
 0xbec   :  { %v2848_v48 = vpop.eup %2847  ;;  %v1202_v57 = vmul.f32 %v2846_v39, %v3356_v25 }
 0xbed   :  { %v1293_v45 = vmul.f32 %v2848_v48, %v3361_v35 }
 0xc45   :  { %v1206_v36 = vpop.permute.xlu1 %1205 }
 0xc46   :  { %v1211_v37 = vmul.f32 %v2842_v59, %v1206_v36 }
 0xc48   :  { %1215 = vrot.lane.b32.xlu1 %v1211_v37, %s3010_s22 }
 0xc49   :  { %v1297_v40 = vpop.permute.xlu1 %1296  ;;  %v1208_v44 = vpop.permute.xlu0 %1207 }
 0xc4a   :  { %v1302_v46 = vmul.f32 %v2844_v62, %v1297_v40  ;;  %v1212_v22 = vmul.f32 %v2846_v39, %v1208_v44  ;;  %v216_v44 = vadd.f32 %v3481_v21, %v3267_v28 }
 0xc4c   :  { %1306 = vrot.lane.b32.xlu1 %v1302_v46, %s3010_s22  ;;  %1217 = vrot.lane.b32.xlu0 %v1212_v22, %s3010_s22 }
 0xc4d   :  { %v1299_v50 = vpop.permute.xlu0 %1298 }
 0xc4e   :  { %v1303_v52 = vmul.f32 %v2848_v48, %v1299_v50 }
 0xc50   :  { %1308 = vrot.lane.b32.xlu0 %v1303_v52, %s3010_s22 }
 0xcba   :  { %v1216_v53 = vpop.permute.xlu1 %1215 }
 0xcbb   :  { %v3416_v60 = vadd.f32 %v1216_v53, %v1201_v24 }
 0xcbd   :  { %2849 = vtanh.f32 %v3416_v60 }
 0xcbe   :  { %v1307_v54 = vpop.permute.xlu1 %1306  ;;  %v1218_v38 = vpop.permute.xlu0 %1217 }
 0xcbf   :  { %v3421_v63 = vadd.f32 %v1307_v54, %v1292_v42  ;;  %v3423_v61 = vadd.f32 %v1218_v38, %v1202_v57 }
 0xcc1   :  { %2851 = vtanh.f32 %v3421_v63 }
 0xcc2   :  { %2853 = vtanh.f32 %v3423_v61  ;;  %v1309_v10 = vpop.permute.xlu0 %1308 }
 0xcc3   :  { %v3428_v43 = vadd.f32 %v1309_v10, %v1293_v45 }
 0xcc5   :  { %2855 = vtanh.f32 %v3428_v43 }
 0xcca   :  { %v2850_v23 = vpop.eup %2849 }
 0xccb   :  { %1227 = vrot.lane.b32.xlu1 %v2850_v23, %s3010_s22 }
 0xcce   :  { %v2852_v25 = vpop.eup %2851 }
 0xccf   :  { %v2854_v41 = vpop.eup %2853  ;;  %1318 = vrot.lane.b32.xlu1 %v2852_v25, %s3010_s22 }
 0xcd0   :  { %1229 = vrot.lane.b32.xlu0 %v2854_v41, %s3010_s22 }
 0xcd2   :  { %v2856_v0 = vpop.eup %2855 }
 0xcd4   :  { %1320 = vrot.lane.b32.xlu0 %v2856_v0, %s3010_s22 }
 0xd3d   :  { %v1228_v35 = vpop.permute.xlu1 %1227 }
 0xd3e   :  { %v1233_v4 = vmul.f32 %v2842_v59, %v1228_v35 }
 0xd41   :  { %v1319_v47 = vpop.permute.xlu1 %1318 }
 0xd42   :  { %v1230_v3 = vpop.permute.xlu0 %1229  ;;  %v1324_v9 = vmul.f32 %v2844_v62, %v1319_v47 }
 0xd43   :  { %v1234_v6 = vmul.f32 %v2846_v39, %v1230_v3 }
 0xd45   :  { %v1327_v7 = vpack.c.bf16 %v1234_v6, %v1233_v4 }
 0xd46   :  { %v1321_v8 = vpop.permute.xlu0 %1320 }
 0xd47   :  { %v1325_v12 = vmul.f32 %v2848_v48, %v1321_v8  ;;  %1329 = vrot.lane.b32.xlu1 %v1327_v7, %s3011_s10 }
 0xd49   :  { %v1326_v13 = vpack.c.bf16 %v1325_v12, %v1324_v9 }
 0xd4b   :  { %1376 = vrot.lane.b32.xlu0 %v1326_v13, %s3011_s10 }
 0xdb9   :  { %v1330_v14 = vpop.permute.xlu1 %1329 }
 0xdba   :  { %2595 = vmatmul.mubr.msk.bf16.vlgmr.msra.gmra.mxu1 %vm260_vm3, %v1330_v14 }
 0xdbb   :  { %2607 = vmatpush3.bf16.msra.mxu1 %v3374_v55  ;;  %2610 = vmatprep.mubr.msk.bf16.mxu1 %vm3008_vm2, %v3007_v1 }
 0xdbc   :  { %2608 = vmatprep.subr.bf16.mxu1 %v3007_v1 }
 0xdbd   :  { %v1377_v27 = vpop.permute.xlu0 %1376 }
 0xdbe   :  { %2603 = vmatmul.mubr.msk.bf16.vlgmr.msra.gmra.mxu0 %vm260_vm3, %v1377_v27 }
 0xdbf   :  { %2609 = vmatpush3.bf16.msra.mxu1 %v3384_v51  ;;  %2615 = vmatpush3.bf16.msra.mxu0 %v3447_v2 }
 0xdc0   :  { %2622 = vmatprep.subr.bf16.mxu1 %v3007_v1  ;;  %2616 = vmatprep.subr.bf16.mxu0 %v3007_v1 }
 0xdc1   :  { %2618 = vmatprep.mubr.msk.bf16.mxu0 %vm3008_vm2, %v3007_v1 }
 0xdc2   :  { %2611 = vmatmul.mubr.msk.bf16.vlgmr.msra.gmra.mxu1 %vm260_vm3, %v1377_v27 }
 0xdc3   :  { %2623 = vmatpush3.bf16.msra.mxu1 %v3458_v5  ;;  %2617 = vmatpush3.bf16.msra.mxu0 %v3464_v15 }
 0xdc4   :  { %2624 = vmatprep.subr.bf16.mxu1 %v3007_v1  ;;  %2630 = vmatprep.subr.bf16.mxu0 %v3007_v1 }
 0xdc5   :  { %2626 = vmatprep.mubr.msk.bf16.mxu1 %vm3008_vm2, %v3007_v1 }
 0xdc7   :  { %2625 = vmatpush3.bf16.msra.mxu1 %v3474_v11 }
 0xdc8   :  { %2638 = vmatprep.subr.bf16.mxu1 %v3007_v1 }
 0xe7a   :  { %v1368_v58 = vpop.f32.mrf.mxu1 }
 0xe7c   :  { %v2596_v29 = vpop.f32.mrf.mxu1 }
 0xe7e   :  { %v1371_v17 = vpop.f32.mrf.mxu1  ;;  %v1415_v18 = vpop.f32.mrf.mxu0 }
 0xe7f   :  { %v1416_v19 = vadd.f32 %v1415_v18, %v1368_v58 }
 0xe80   :  { %v2597_v20 = vpop.f32.mrf.mxu1  ;;  %v2604_v16 = vpop.f32.mrf.mxu0 }
 0xe81   :  { %v1422_v56 = vadd.f32 %v3488_v49, %v1416_v19 }
 0xe82   :  { %v1418_v59 = vpop.f32.mrf.mxu0  ;;  %v1506_v36 = vpop.f32.mrf.mxu1 }
 0xe83   :  { %2857 = vtanh.f32 %v1422_v56  ;;  %v1419_v37 = vadd.f32 %v1418_v59, %v1371_v17  ;;  %v1513_v62 = vadd.f32 %v1506_v36, %v213_v34  ;;  %v2354_v28 = vmul.f32 -1.442695, %v1422_v56 }
 0xe84   :  { %v2605_v39 = vpop.f32.mrf.mxu0  ;;  %v2612_v40 = vpop.f32.mrf.mxu1 }
 0xe85   :  { %v1423_v46 = vadd.f32 %v3488_v49, %v1419_v37  ;;  %2859 = vtanh.f32 %v1513_v62  ;;  %v2357_v42 = vmul.f32 -1.442695, %v1513_v62 }
 0xe86   :  { %v1509_v26 = vpop.f32.mrf.mxu1 }
 0xe87   :  { %2861 = vtanh.f32 %v1423_v46  ;;  %v1514_v22 = vadd.f32 %v1509_v26, %v216_v44  ;;  %v2355_v57 = vmul.f32 -1.442695, %v1423_v46 }
 0xe88   :  { %v2613_v48 = vpop.f32.mrf.mxu1 }
 0xe89   :  { %2863 = vtanh.f32 %v1514_v22  ;;  %v2358_v54 = vmul.f32 -1.442695, %v1514_v22 }
 0xe8a   :  { %2865 = vpow2.f32 %v2354_v28 }
 0xe8b   :  { %2867 = vpow2.f32 %v2357_v42 }
 0xe8c   :  { %2869 = vpow2.f32 %v2355_v57 }
 0xe8d   :  { %2871 = vpow2.f32 %v2358_v54 }
 0xe90   :  { %v2858_v50 = vpop.eup %2857 }
 0xe91   :  { %1442 = vrot.lane.b32.xlu1 %v2858_v50, %s3010_s22 }
 0xe92   :  { %v2860_v52 = vpop.eup %2859 }
 0xe94   :  { %v2862_v24 = vpop.eup %2861 }
 0xe95   :  { %1444 = vrot.lane.b32.xlu0 %v2862_v24, %s3010_s22  ;;  %1533 = vrot.lane.b32.xlu1 %v2860_v52, %s3010_s22 }
 0xe96   :  { %v2864_v53 = vpop.eup %2863 }
 0xe97   :  { %v2866_v38 = vpop.eup %2865 }
 0xe98   :  { %v2868_v45 = vpop.eup %2867  ;;  %v1430_v10 = vadd.f32 1.0, %v2866_v38 }
 0xe99   :  { %1535 = vrot.lane.b32.xlu0 %v2864_v53, %s3010_s22  ;;  %v2870_v23 = vpop.eup %2869  ;;  %v1521_v25 = vadd.f32 1.0, %v2868_v45 }
 0xe9a   :  { %2873 = vrcp.f32 %v1430_v10  ;;  %v1431_v41 = vadd.f32 1.0, %v2870_v23  ;;  %v2872_v0 = vpop.eup %2871 }
 0xe9b   :  { %2875 = vrcp.f32 %v1521_v25  ;;  %v1522_v35 = vadd.f32 1.0, %v2872_v0  ;;  %v221_v25 = vadd.f32 %v3481_v21, %v3273_v31 }
 0xe9c   :  { %2877 = vrcp.f32 %v1431_v41 }
 0xe9d   :  { %2879 = vrcp.f32 %v1522_v35 }
 0xea7   :  { %v2874_v3 = vpop.eup %2873 }
 0xea8   :  { %v2876_v47 = vpop.eup %2875  ;;  %v1438_v29 = vmul.f32 %v2874_v3, %v3416_v60 }
 0xea9   :  { %v2878_v7 = vpop.eup %2877  ;;  %v1529_v19 = vmul.f32 %v2876_v47, %v3421_v63 }
 0xeaa   :  { %v2880_v14 = vpop.eup %2879  ;;  %v1439_v20 = vmul.f32 %v2878_v7, %v3423_v61 }
 0xeab   :  { %v1530_v36 = vmul.f32 %v2880_v14, %v3428_v43 }
 0xf03   :  { %v1443_v4 = vpop.permute.xlu1 %1442 }
 0xf04   :  { %v1448_v6 = vmul.f32 %v2874_v3, %v1443_v4 }
 0xf06   :  { %1452 = vrot.lane.b32.xlu1 %v1448_v6, %s3010_s22 }
 0xf07   :  { %v1445_v8 = vpop.permute.xlu0 %1444  ;;  %v1534_v9 = vpop.permute.xlu1 %1533 }
 0xf08   :  { %v1449_v12 = vmul.f32 %v2878_v7, %v1445_v8  ;;  %v1539_v13 = vmul.f32 %v2876_v47, %v1534_v9 }
 0xf0a   :  { %1543 = vrot.lane.b32.xlu1 %v1539_v13, %s3010_s22  ;;  %1454 = vrot.lane.b32.xlu0 %v1449_v12, %s3010_s22 }
 0xf0b   :  { %v1536_v27 = vpop.permute.xlu0 %1535 }
 0xf0c   :  { %v1540_v58 = vmul.f32 %v2880_v14, %v1536_v27 }
 0xf0e   :  { %1545 = vrot.lane.b32.xlu0 %v1540_v58, %s3010_s22 }
 0xf78   :  { %v1453_v17 = vpop.permute.xlu1 %1452 }
 0xf79   :  { %v3503_v18 = vadd.f32 %v1453_v17, %v1438_v29 }
 0xf7b   :  { %2881 = vtanh.f32 %v3503_v18 }
 0xf7c   :  { %v1544_v16 = vpop.permute.xlu1 %1543  ;;  %v1455_v34 = vpop.permute.xlu0 %1454 }
 0xf7d   :  { %v3508_v56 = vadd.f32 %v1544_v16, %v1529_v19  ;;  %v3510_v59 = vadd.f32 %v1455_v34, %v1439_v20 }
 0xf7f   :  { %2883 = vtanh.f32 %v3508_v56 }
 0xf80   :  { %2885 = vtanh.f32 %v3510_v59  ;;  %v1546_v60 = vpop.permute.xlu0 %1545 }
 0xf81   :  { %v3515_v37 = vadd.f32 %v1546_v60, %v1530_v36 }
 0xf83   :  { %2887 = vtanh.f32 %v3515_v37 }
 0xf88   :  { %v2882_v63 = vpop.eup %2881 }
 0xf89   :  { %1464 = vrot.lane.b32.xlu1 %v2882_v63, %s3010_s22 }
 0xf8c   :  { %v2884_v61 = vpop.eup %2883 }
 0xf8d   :  { %v2886_v62 = vpop.eup %2885  ;;  %1555 = vrot.lane.b32.xlu1 %v2884_v61, %s3010_s22 }
 0xf8e   :  { %1466 = vrot.lane.b32.xlu0 %v2886_v62, %s3010_s22 }
 0xf90   :  { %v2888_v39 = vpop.eup %2887 }
 0xf92   :  { %1557 = vrot.lane.b32.xlu0 %v2888_v39, %s3010_s22 }
 0xffb   :  { %v1465_v43 = vpop.permute.xlu1 %1464 }
 0xffc   :  { %v1470_v44 = vmul.f32 %v2874_v3, %v1465_v43 }
 0xfff   :  { %v1556_v26 = vpop.permute.xlu1 %1555 }
0x1000   :  { %v1467_v40 = vpop.permute.xlu0 %1466  ;;  %v1561_v50 = vmul.f32 %v2876_v47, %v1556_v26 }
0x1001   :  { %v1471_v46 = vmul.f32 %v2878_v7, %v1467_v40  ;;  %v224_v7 = vadd.f32 %v3481_v21, %v3277_v33 }
0x1003   :  { %v1564_v22 = vpack.c.bf16 %v1471_v46, %v1470_v44 }
0x1004   :  { %v1558_v48 = vpop.permute.xlu0 %1557 }
0x1005   :  { %v1562_v52 = vmul.f32 %v2880_v14, %v1558_v48  ;;  %1566 = vrot.lane.b32.xlu1 %v1564_v22, %s3011_s10 }
0x1007   :  { %v1563_v24 = vpack.c.bf16 %v1562_v52, %v1561_v50 }
0x1009   :  { %1613 = vrot.lane.b32.xlu0 %v1563_v24, %s3011_s10 }
0x1077   :  { %v1567_v53 = vpop.permute.xlu1 %1566 }
0x1078   :  { %2619 = vmatmul.mubr.msk.bf16.vlgmr.msra.gmra.mxu0 %vm260_vm3, %v1567_v53 }
0x1079   :  { %2631 = vmatpush3.bf16.msra.mxu0 %v3374_v55  ;;  %2634 = vmatprep.mubr.msk.bf16.mxu0 %vm3008_vm2, %v3007_v1 }
0x107a   :  { %2632 = vmatprep.subr.bf16.mxu0 %v3007_v1 }
0x107b   :  { %v1614_v28 = vpop.permute.xlu0 %1613 }
0x107c   :  { %2627 = vmatmul.mubr.msk.bf16.vlgmr.msra.gmra.mxu1 %vm260_vm3, %v1614_v28 }
0x107d   :  { %2633 = vmatpush3.bf16.msra.mxu0 %v3384_v51  ;;  %2639 = vmatpush3.bf16.msra.mxu1 %v3447_v2 }
0x107e   :  { %2646 = vmatprep.subr.bf16.mxu0 %v3007_v1  ;;  %2640 = vmatprep.subr.bf16.mxu1 %v3007_v1 }
0x107f   :  { %2642 = vmatprep.mubr.msk.bf16.mxu1 %vm3008_vm2, %v3007_v1 }
0x1080   :  { %2635 = vmatmul.mubr.msk.bf16.vlgmr.msra.gmra.mxu0 %vm260_vm3, %v1614_v28 }
0x1081   :  { %2647 = vmatpush3.bf16.msra.mxu0 %v3458_v5  ;;  %2641 = vmatpush3.bf16.msra.mxu1 %v3464_v15 }
0x1082   :  { %2648 = vmatprep.subr.bf16.mxu0 %v3007_v1  ;;  %2654 = vmatprep.subr.bf16.mxu1 %v3007_v1 }
0x1083   :  { %2650 = vmatprep.mubr.msk.bf16.mxu0 %vm3008_vm2, %v3007_v1 }
0x1085   :  { %2649 = vmatpush3.bf16.msra.mxu0 %v3474_v11 }
0x1086   :  { %2662 = vmatprep.subr.bf16.mxu0 %v3007_v1 }
0x1138   :  { %v1605_v42 = vpop.f32.mrf.mxu0 }
0x113a   :  { %v2620_v57 = vpop.f32.mrf.mxu0 }
0x113c   :  { %v1608_v54 = vpop.f32.mrf.mxu0  ;;  %v1652_v38 = vpop.f32.mrf.mxu1 }
0x113d   :  { %v1653_v45 = vadd.f32 %v1652_v38, %v1605_v42 }
0x113e   :  { %v2621_v10 = vpop.f32.mrf.mxu0  ;;  %v2628_v23 = vpop.f32.mrf.mxu1 }
0x113f   :  { %v1659_v41 = vadd.f32 %v3488_v49, %v1653_v45 }
0x1140   :  { %v1655_v0 = vpop.f32.mrf.mxu1  ;;  %v1743_v35 = vpop.f32.mrf.mxu0 }
0x1141   :  { %2889 = vtanh.f32 %v1659_v41  ;;  %v1656_v3 = vadd.f32 %v1655_v0, %v1608_v54  ;;  %v1750_v4 = vadd.f32 %v1743_v35, %v221_v25  ;;  %v2361_v33 = vmul.f32 -1.442695, %v1659_v41 }
0x1142   :  { %v2629_v6 = vpop.f32.mrf.mxu1  ;;  %v2636_v47 = vpop.f32.mrf.mxu0 }
0x1143   :  { %v1660_v8 = vadd.f32 %v3488_v49, %v1656_v3  ;;  %2891 = vtanh.f32 %v1750_v4  ;;  %v2364_v29 = vmul.f32 -1.442695, %v1750_v4 }
0x1144   :  { %v1746_v9 = vpop.f32.mrf.mxu0 }
0x1145   :  { %2893 = vtanh.f32 %v1660_v8  ;;  %v1751_v12 = vadd.f32 %v1746_v9, %v224_v7  ;;  %v2362_v17 = vmul.f32 -1.442695, %v1660_v8 }
0x1146   :  { %v2637_v13 = vpop.f32.mrf.mxu0 }
0x1147   :  { %2895 = vtanh.f32 %v1751_v12  ;;  %v2365_v19 = vmul.f32 -1.442695, %v1751_v12 }
0x1148   :  { %2897 = vpow2.f32 %v2361_v33 }
0x1149   :  { %2899 = vpow2.f32 %v2364_v29 }
0x114a   :  { %2901 = vpow2.f32 %v2362_v17 }
0x114b   :  { %2903 = vpow2.f32 %v2365_v19 }
0x114e   :  { %v2890_v31 = vpop.eup %2889 }
0x114f   :  { %1679 = vrot.lane.b32.xlu1 %v2890_v31, %s3010_s22 }
0x1150   :  { %v2892_v14 = vpop.eup %2891 }
0x1152   :  { %v2894_v27 = vpop.eup %2893 }
0x1153   :  { %1770 = vrot.lane.b32.xlu1 %v2892_v14, %s3010_s22  ;;  %1681 = vrot.lane.b32.xlu0 %v2894_v27, %s3010_s22 }
0x1154   :  { %v2896_v58 = vpop.eup %2895 }
0x1155   :  { %v2898_v20 = vpop.eup %2897 }
0x1156   :  { %v2900_v16 = vpop.eup %2899  ;;  %v1667_v34 = vadd.f32 1.0, %v2898_v20 }
0x1157   :  { %1772 = vrot.lane.b32.xlu0 %v2896_v58, %s3010_s22  ;;  %v2902_v36 = vpop.eup %2901  ;;  %v1758_v60 = vadd.f32 1.0, %v2900_v16 }
0x1158   :  { %2905 = vrcp.f32 %v1667_v34  ;;  %v1668_v63 = vadd.f32 1.0, %v2902_v36  ;;  %v2904_v61 = vpop.eup %2903 }
0x1159   :  { %2907 = vrcp.f32 %v1758_v60  ;;  %v1759_v62 = vadd.f32 1.0, %v2904_v61 }
0x115a   :  { %2909 = vrcp.f32 %v1668_v63 }
0x115b   :  { %2911 = vrcp.f32 %v1759_v62 }
0x1165   :  { %v2906_v39 = vpop.eup %2905 }
0x1166   :  { %v2908_v44 = vpop.eup %2907  ;;  %v1675_v28 = vmul.f32 %v2906_v39, %v3503_v18 }
0x1167   :  { %v2910_v46 = vpop.eup %2909  ;;  %v1766_v54 = vmul.f32 %v2908_v44, %v3508_v56 }
0x1168   :  { %v2912_v52 = vpop.eup %2911  ;;  %v1676_v38 = vmul.f32 %v2910_v46, %v3510_v59 }
0x1169   :  { %v1767_v41 = vmul.f32 %v2912_v52, %v3515_v37 }
0x11c1   :  { %v1680_v43 = vpop.permute.xlu1 %1679 }
0x11c2   :  { %v1685_v40 = vmul.f32 %v2906_v39, %v1680_v43 }
0x11c4   :  { %1689 = vrot.lane.b32.xlu1 %v1685_v40, %s3010_s22 }
0x11c5   :  { %v1771_v26 = vpop.permute.xlu1 %1770  ;;  %v1682_v22 = vpop.permute.xlu0 %1681 }
0x11c6   :  { %v1776_v48 = vmul.f32 %v2908_v44, %v1771_v26  ;;  %v1686_v50 = vmul.f32 %v2910_v46, %v1682_v22 }
0x11c8   :  { %1780 = vrot.lane.b32.xlu1 %v1776_v48, %s3010_s22  ;;  %1691 = vrot.lane.b32.xlu0 %v1686_v50, %s3010_s22 }
0x11c9   :  { %v1773_v24 = vpop.permute.xlu0 %1772 }
0x11ca   :  { %v1777_v53 = vmul.f32 %v2912_v52, %v1773_v24 }
0x11cc   :  { %1782 = vrot.lane.b32.xlu0 %v1777_v53, %s3010_s22 }
0x1236   :  { %v1690_v42 = vpop.permute.xlu1 %1689 }
0x1237   :  { %v3560_v57 = vadd.f32 %v1690_v42, %v1675_v28 }
0x1239   :  { %2913 = vtanh.f32 %v3560_v57 }
0x123a   :  { %v1781_v45 = vpop.permute.xlu1 %1780  ;;  %v1692_v10 = vpop.permute.xlu0 %1691 }
0x123b   :  { %v3565_v23 = vadd.f32 %v1781_v45, %v1766_v54  ;;  %v3567_v25 = vadd.f32 %v1692_v10, %v1676_v38 }
0x123d   :  { %2915 = vtanh.f32 %v3565_v23 }
0x123e   :  { %2917 = vtanh.f32 %v3567_v25  ;;  %v1783_v18 = vpop.permute.xlu0 %1782 }
0x123f   :  { %v3572_v0 = vadd.f32 %v1783_v18, %v1767_v41 }
0x1241   :  { %2919 = vtanh.f32 %v3572_v0 }
0x1246   :  { %v2914_v56 = vpop.eup %2913 }
0x1247   :  { %1701 = vrot.lane.b32.xlu1 %v2914_v56, %s3010_s22 }
0x124a   :  { %v2916_v59 = vpop.eup %2915 }
0x124b   :  { %v2918_v35 = vpop.eup %2917  ;;  %1792 = vrot.lane.b32.xlu1 %v2916_v59, %s3010_s22 }
0x124c   :  { %1703 = vrot.lane.b32.xlu0 %v2918_v35, %s3010_s22 }
0x124e   :  { %v2920_v3 = vpop.eup %2919 }
0x1250   :  { %1794 = vrot.lane.b32.xlu0 %v2920_v3, %s3010_s22 }
0x12b9   :  { %v1702_v37 = vpop.permute.xlu1 %1701 }
0x12ba   :  { %v1707_v6 = vmul.f32 %v2906_v39, %v1702_v37 }
0x12bd   :  { %v1793_v7 = vpop.permute.xlu1 %1792 }
0x12be   :  { %v1704_v4 = vpop.permute.xlu0 %1703  ;;  %v1798_v12 = vmul.f32 %v2908_v44, %v1793_v7 }
0x12bf   :  { %v1708_v47 = vmul.f32 %v2910_v46, %v1704_v4 }
0x12c1   :  { %v1801_v8 = vpack.c.bf16 %v1708_v47, %v1707_v6 }
0x12c2   :  { %v1795_v9 = vpop.permute.xlu0 %1794 }
0x12c3   :  { %v1799_v13 = vmul.f32 %v2912_v52, %v1795_v9  ;;  %1803 = vrot.lane.b32.xlu1 %v1801_v8, %s3011_s10 }
0x12c5   :  { %v1800_v31 = vpack.c.bf16 %v1799_v13, %v1798_v12 }
0x12c7   :  { %1850 = vrot.lane.b32.xlu0 %v1800_v31, %s3011_s10 }
0x1335   :  { %v1804_v14 = vpop.permute.xlu1 %1803 }
0x1336   :  { %2643 = vmatmul.mubr.msk.bf16.vlgmr.msra.gmra.mxu1 %vm260_vm3, %v1804_v14 }
0x1337   :  { %2655 = vmatpush3.bf16.msra.mxu1 %v3374_v55  ;;  %2658 = vmatprep.mubr.msk.bf16.mxu1 %vm3008_vm2, %v3007_v1 }
0x1338   :  { %2656 = vmatprep.subr.bf16.mxu1 %v3007_v1 }
0x1339   :  { %v1851_v27 = vpop.permute.xlu0 %1850 }
0x133a   :  { %2651 = vmatmul.mubr.msk.bf16.vlgmr.msra.gmra.mxu0 %vm260_vm3, %v1851_v27 }
0x133b   :  { %2657 = vmatpush3.bf16.msra.mxu1 %v3384_v51  ;;  %2663 = vmatpush3.bf16.msra.mxu0 %v3447_v2 }
0x133c   :  { %2670 = vmatprep.subr.bf16.mxu1 %v3007_v1  ;;  %2664 = vmatprep.subr.bf16.mxu0 %v3007_v1 }
0x133d   :  { %2666 = vmatprep.mubr.msk.bf16.mxu0 %vm3008_vm2, %v3007_v1 }
0x133e   :  { %2659 = vmatmul.mubr.msk.bf16.vlgmr.msra.gmra.mxu1 %vm260_vm3, %v1851_v27 }
0x133f   :  { %2671 = vmatpush3.bf16.msra.mxu1 %v3458_v5  ;;  %2665 = vmatpush3.bf16.msra.mxu0 %v3464_v15  ;;  %v229_v5 = vadd.f32 %v3481_v21, %v3271_v30 }
0x1340   :  { %2672 = vmatprep.subr.bf16.mxu1 %v3007_v1  ;;  %2674 = vmatprep.mubr.msk.bf16.mxu1 %vm3008_vm2, %v3007_v1 }
0x1341   :  { %2678 = vmatprep.subr.bf16.mxu0 %v3007_v1 }
0x1343   :  { %2673 = vmatpush3.bf16.msra.mxu1 %v3474_v11  ;;  %v232_v11 = vadd.f32 %v3481_v21, %v3275_v32 }
0x13f6   :  { %v1842_v55 = vpop.f32.mrf.mxu1 }
0x13f8   :  { %v2644_v51 = vpop.f32.mrf.mxu1 }
0x13fa   :  { %v1845_v2 = vpop.f32.mrf.mxu1  ;;  %v1889_v58 = vpop.f32.mrf.mxu0 }
0x13fb   :  { %v1890_v33 = vadd.f32 %v1889_v58, %v1842_v55 }
0x13fc   :  { %v2645_v29 = vpop.f32.mrf.mxu1  ;;  %v2652_v17 = vpop.f32.mrf.mxu0 }
0x13fd   :  { %v1896_v15 = vadd.f32 %v3488_v49, %v1890_v33 }
0x13fe   :  { %v1892_v19 = vpop.f32.mrf.mxu0  ;;  %v1980_v20 = vpop.f32.mrf.mxu1 }
0x13ff   :  { %2921 = vtanh.f32 %v1896_v15  ;;  %v1893_v16 = vadd.f32 %v1892_v19, %v1845_v2  ;;  %v1987_v34 = vadd.f32 %v1980_v20, %v229_v5  ;;  %v2368_v32 = vmul.f32 -1.442695, %v1896_v15 }
0x1400   :  { %v2653_v36 = vpop.f32.mrf.mxu0  ;;  %v2660_v60 = vpop.f32.mrf.mxu1 }
0x1401   :  { %v1897_v63 = vadd.f32 %v3488_v49, %v1893_v16  ;;  %2923 = vtanh.f32 %v1987_v34  ;;  %v2371_v21 = vmul.f32 -1.442695, %v1987_v34 }
0x1402   :  { %v1983_v61 = vpop.f32.mrf.mxu1 }
0x1403   :  { %2925 = vtanh.f32 %v1897_v63  ;;  %v1988_v62 = vadd.f32 %v1983_v61, %v232_v11  ;;  %v2369_v46 = vmul.f32 -1.442695, %v1897_v63 }
0x1404   :  { %v2661_v39 = vpop.f32.mrf.mxu1 }
0x1405   :  { %2927 = vtanh.f32 %v1988_v62  ;;  %v2372_v26 = vmul.f32 -1.442695, %v1988_v62 }
0x1406   :  { %2929 = vpow2.f32 %v2368_v32 }
0x1407   :  { %2931 = vpow2.f32 %v2371_v21 }
0x1408   :  { %2933 = vpow2.f32 %v2369_v46 }
0x1409   :  { %2935 = vpow2.f32 %v2372_v26 }
0x140c   :  { %v2922_v30 = vpop.eup %2921 }
0x140d   :  { %1916 = vrot.lane.b32.xlu1 %v2922_v30, %s3010_s22 }
0x140e   :  { %v2924_v43 = vpop.eup %2923 }
0x1410   :  { %v2926_v40 = vpop.eup %2925 }
0x1411   :  { %1918 = vrot.lane.b32.xlu0 %v2926_v40, %s3010_s22  ;;  %2007 = vrot.lane.b32.xlu1 %v2924_v43, %s3010_s22 }
0x1412   :  { %v2928_v44 = vpop.eup %2927 }
0x1413   :  { %v2930_v22 = vpop.eup %2929 }
0x1414   :  { %v2932_v48 = vpop.eup %2931  ;;  %v1904_v50 = vadd.f32 1.0, %v2930_v22 }
0x1415   :  { %2009 = vrot.lane.b32.xlu0 %v2928_v44, %s3010_s22  ;;  %v2934_v52 = vpop.eup %2933  ;;  %v1995_v24 = vadd.f32 1.0, %v2932_v48 }
0x1416   :  { %2937 = vrcp.f32 %v1904_v50  ;;  %v1905_v53 = vadd.f32 1.0, %v2934_v52  ;;  %v2936_v28 = vpop.eup %2935 }
0x1417   :  { %2939 = vrcp.f32 %v1995_v24  ;;  %v1996_v42 = vadd.f32 1.0, %v2936_v28 }
0x1418   :  { %2941 = vrcp.f32 %v1905_v53 }
0x1419   :  { %2943 = vrcp.f32 %v1996_v42 }
0x1423   :  { %v2938_v54 = vpop.eup %2937 }
0x1424   :  { %v2940_v10 = vpop.eup %2939  ;;  %v1912_v6 = vmul.f32 %v2938_v54, %v3560_v57 }
0x1425   :  { %v2942_v41 = vpop.eup %2941  ;;  %v2003_v8 = vmul.f32 %v2940_v10, %v3565_v23 }
0x1426   :  { %v2944_v3 = vpop.eup %2943  ;;  %v1913_v9 = vmul.f32 %v2942_v41, %v3567_v25 }
0x1427   :  { %v2004_v27 = vmul.f32 %v2944_v3, %v3572_v0 }
0x147f   :  { %v1917_v38 = vpop.permute.xlu1 %1916 }
0x1480   :  { %v1922_v45 = vmul.f32 %v2938_v54, %v1917_v38 }
0x1482   :  { %1926 = vrot.lane.b32.xlu1 %v1922_v45, %s3010_s22 }
0x1483   :  { %v1919_v18 = vpop.permute.xlu0 %1918  ;;  %v2008_v56 = vpop.permute.xlu1 %2007 }
0x1484   :  { %v1923_v59 = vmul.f32 %v2942_v41, %v1919_v18  ;;  %v2013_v35 = vmul.f32 %v2940_v10, %v2008_v56 }
0x1486   :  { %2017 = vrot.lane.b32.xlu1 %v2013_v35, %s3010_s22  ;;  %1928 = vrot.lane.b32.xlu0 %v1923_v59, %s3010_s22 }
0x1487   :  { %v2010_v37 = vpop.permute.xlu0 %2009 }
0x1488   :  { %v2014_v4 = vmul.f32 %v2944_v3, %v2010_v37  ;;  %v2712_v37 = vld [vmem:[%s3673_s7] sm:$0xff]  }
0x148a   :  { %2019 = vrot.lane.b32.xlu0 %v2014_v4, %s3010_s22 }
0x14f4   :  { %v1927_v47 = vpop.permute.xlu1 %1926 }
0x14f5   :  { %v3616_v7 = vadd.f32 %v1927_v47, %v1912_v6 }
0x14f7   :  { %2945 = vtanh.f32 %v3616_v7 }
0x14f8   :  { %v2018_v12 = vpop.permute.xlu1 %2017  ;;  %v1929_v13 = vpop.permute.xlu0 %1928 }
0x14f9   :  { %v2023_v31 = vadd.f32 %v2018_v12, %v2003_v8  ;;  %v3621_v14 = vadd.f32 %v1929_v13, %v1913_v9 }
0x14fb   :  { %2947 = vtanh.f32 %v2023_v31 }
0x14fc   :  { %2949 = vtanh.f32 %v3621_v14  ;;  %v2020_v57 = vpop.permute.xlu0 %2019 }
0x14fd   :  { %v2024_v55 = vadd.f32 %v2020_v57, %v2004_v27 }
0x14ff   :  { %2951 = vtanh.f32 %v2024_v55 }
0x1504   :  { %v2946_v51 = vpop.eup %2945 }
0x1505   :  { %1938 = vrot.lane.b32.xlu1 %v2946_v51, %s3010_s22 }
0x1508   :  { %v2948_v2 = vpop.eup %2947 }
0x1509   :  { %v2950_v23 = vpop.eup %2949  ;;  %2029 = vrot.lane.b32.xlu1 %v2948_v2, %s3010_s22 }
0x150a   :  { %1940 = vrot.lane.b32.xlu0 %v2950_v23, %s3010_s22 }
0x150c   :  { %v2952_v25 = vpop.eup %2951 }
0x150e   :  { %2031 = vrot.lane.b32.xlu0 %v2952_v25, %s3010_s22 }
0x1577   :  { %v1939_v58 = vpop.permute.xlu1 %1938 }
0x1578   :  { %v1944_v0 = vmul.f32 %v2938_v54, %v1939_v58 }
0x157b   :  { %v2030_v17 = vpop.permute.xlu1 %2029 }
0x157c   :  { %v1941_v33 = vpop.permute.xlu0 %1940  ;;  %v2035_v19 = vmul.f32 %v2940_v10, %v2030_v17 }
0x157d   :  { %v1945_v29 = vmul.f32 %v2942_v41, %v1941_v33 }
0x157f   :  { %v2038_v5 = vpack.c.bf16 %v1945_v29, %v1944_v0 }
0x1580   :  { %v2032_v15 = vpop.permute.xlu0 %2031 }
0x1581   :  { %v2036_v20 = vmul.f32 %v2944_v3, %v2032_v15  ;;  %2040 = vrot.lane.b32.xlu1 %v2038_v5, %s3011_s10  ;;  %v2711_v3 = vld [vmem:[%s3673_s7 + $0x8] sm:$0xff]  }
0x1583   :  { %v2037_v16 = vpack.c.bf16 %v2036_v20, %v2035_v19 }
0x1585   :  { %2087 = vrot.lane.b32.xlu0 %v2037_v16, %s3011_s10 }
0x15f3   :  { %v2041_v34 = vpop.permute.xlu1 %2040 }
0x15f4   :  { %2667 = vmatmul.mubr.msk.bf16.vlgmr.msra.gmra.mxu0 %vm260_vm3, %v2041_v34 }
0x15f5   :  { %2682 = vmatprep.mubr.msk.bf16.mxu0 %vm3008_vm2, %v3007_v1  ;;  %2679 = vmatpush3.bf16.msra.mxu0 %v2711_v3 }
0x15f6   :  { %2680 = vmatprep.subr.bf16.mxu0 %v3007_v1  ;;  %v2377_v1 = vld [vmem:[%s3674_s8] ss:$0 sm:$0xff]  ;;  %s3012_s8 = smov [#allocation2]  }
0x15f7   :  { %v2088_v36 = vpop.permute.xlu0 %2087 }
0x15f8   :  { %2675 = vmatmul.mubr.msk.bf16.vlgmr.msra.gmra.mxu1 %vm260_vm3, %v2088_v36 }
0x15f9   :  { %2681 = vmatpush3.bf16.msra.mxu0 %v2712_v37 }
0x16b4   :  { %v2079_v60 = vpop.f32.mrf.mxu0 }
0x16b6   :  { %v2668_v11 = vpop.f32.mrf.mxu0 }
0x16b8   :  { %v2082_v63 = vpop.f32.mrf.mxu0  ;;  %v2126_v61 = vpop.f32.mrf.mxu1 }
0x16b9   :  { %v2127_v62 = vadd.f32 %v2126_v61, %v2079_v60 }
0x16ba   :  { %v2669_v39 = vpop.f32.mrf.mxu0  ;;  %v2676_v30 = vpop.f32.mrf.mxu1 }
0x16bb   :  { %v2133_v43 = vadd.f32 %v3488_v49, %v2127_v62 }
0x16bc   :  { %v2129_v40 = vpop.f32.mrf.mxu1 }
0x16bd   :  { %2953 = vtanh.f32 %v2133_v43  ;;  %v2130_v44 = vadd.f32 %v2129_v40, %v2082_v63  ;;  %v2375_v22 = vmul.f32 -1.442695, %v2133_v43 }
0x16be   :  { %v2677_v32 = vpop.f32.mrf.mxu1 }
0x16bf   :  { %v2134_v21 = vadd.f32 %v3488_v49, %v2130_v44 }
0x16c1   :  { %2955 = vtanh.f32 %v2134_v21  ;;  %v2376_v48 = vmul.f32 -1.442695, %v2134_v21 }
0x16c2   :  { %2957 = vpow2.f32 %v2375_v22 }
0x16c3   :  { %2959 = vpow2.f32 %v2376_v48 }
0x16ca   :  { %v2954_v46 = vpop.eup %2953 }
0x16cb   :  { %2153 = vrot.lane.b32.xlu1 %v2954_v46, %s3010_s22 }
0x16ce   :  { %v2956_v26 = vpop.eup %2955 }
0x16cf   :  { %2155 = vrot.lane.b32.xlu0 %v2956_v26, %s3010_s22  ;;  %v2958_v50 = vpop.eup %2957 }
0x16d0   :  { %v2141_v52 = vadd.f32 1.0, %v2958_v50  ;;  %v2960_v24 = vpop.eup %2959 }
0x16d1   :  { %v2142_v53 = vadd.f32 1.0, %v2960_v24 }
0x16d2   :  { %2961 = vrcp.f32 %v2141_v52 }
0x16d3   :  { %2963 = vrcp.f32 %v2142_v53 }
0x16df   :  { %v2962_v28 = vpop.eup %2961 }
0x16e0   :  { %v2964_v54 = vpop.eup %2963  ;;  %v2149_v10 = vmul.f32 %v2962_v28, %v3616_v7 }
0x16e1   :  { %v2150_v56 = vmul.f32 %v2964_v54, %v3621_v14 }
0x173d   :  { %v2154_v42 = vpop.permute.xlu1 %2153 }
0x173e   :  { %v2159_v49 = vmul.f32 %v2962_v28, %v2154_v42 }
0x1740   :  { %2163 = vrot.lane.b32.xlu1 %v2159_v49, %s3010_s22 }
0x1741   :  { %v2156_v38 = vpop.permute.xlu0 %2155 }
0x1742   :  { %v2160_v45 = vmul.f32 %v2964_v54, %v2156_v38 }
0x1744   :  { %2165 = vrot.lane.b32.xlu0 %v2160_v45, %s3010_s22 }
0x17b2   :  { %v2164_v41 = vpop.permute.xlu1 %2163 }
0x17b3   :  { %v2169_v18 = vadd.f32 %v2164_v41, %v2149_v10 }
0x17b5   :  { %2965 = vtanh.f32 %v2169_v18 }
0x17b6   :  { %v2166_v59 = vpop.permute.xlu0 %2165 }
0x17b7   :  { %v2170_v35 = vadd.f32 %v2166_v59, %v2150_v56 }
0x17b9   :  { %2967 = vtanh.f32 %v2170_v35 }
0x17c2   :  { %v2966_v4 = vpop.eup %2965 }
0x17c3   :  { %2175 = vrot.lane.b32.xlu1 %v2966_v4, %s3010_s22 }
0x17c6   :  { %v2968_v6 = vpop.eup %2967 }
0x17c7   :  { %2177 = vrot.lane.b32.xlu0 %v2968_v6, %s3010_s22  ;;  %s2286_s22 = sshll.u32 %s3012_s8, 4  ;;  %s2287_s22 = int_to_ptr.vmem [resolvable:$true] %s2286_s22 }
0x17c8   :  { %p2990_p1 = scmp.lt.s32.totalorder %s2287_s22, %s2287_s22 }
0x1835   :  { %v2176_v47 = vpop.permute.xlu1 %2175 }
0x1836   :  { %v2181_v8 = vmul.f32 %v2962_v28, %v2176_v47 }
0x1839   :  { %v2178_v7 = vpop.permute.xlu0 %2177 }
0x183a   :  { %v2182_v9 = vmul.f32 %v2964_v54, %v2178_v7 }
0x183c   :  { %v2183_v12 = vpack.c.bf16 %v2182_v9, %v2181_v8 }
0x183e   :  { %2196 = vrot.lane.b32.xlu1 %v2183_v12, %s3011_s10  ;;  %s2985_s10 = scalar_lea.vmem %s2287_s22, 256 }
0x183f   :  { %p2986_p0 = scmp.ne.s32.totalorder %s2287_s22, %s2985_s10  ;;  %p2991_p2 = scmp.lt.s32.totalorder %s2985_s10, %s2985_s10 }
0x1841   :  { %p2992_p3 = por %p2991_p2, %p2990_p1 }
0x1843   :  { %p2993_p4 = pnand %p2992_p3, %p2986_p0 }
0x18b0   :  { %v2197_v13 = vpop.permute.xlu1 %2196 }
0x18b1   :  { %2683 = vmatmul.mubr.msk.bf16.vlgmr.msra.gmra.mxu0 %vm260_vm3, %v2197_v13 }
0x1971   :  { %v2247_v31 = vpop.f32.mrf.mxu0 }
0x1972   :  { %v2248_v14 = vadd.f32 %v2377_v1, %v2247_v31 }
0x1973   :  { %v2684_v27 = vpop.f32.mrf.mxu0 }
0x1974   :  { %v2255_v57 = vsel %vm2254_vm4, %v2248_v14, -inf }
0x1975   :  { %2256 = vmax.xlane.f32.xlu0 %v2255_v57  ;;  %v2250_v55 = vpop.f32.mrf.mxu0 }
0x1976   :  { %v2251_v51 = vadd.f32 %v2377_v1, %v2250_v55 }
0x1977   :  { %v2685_v2 = vpop.f32.mrf.mxu0 }
0x1978   :  { %v2258_v23 = vsel %vm2254_vm4, %v2251_v51, -inf }
0x1979   :  { %2259 = vmax.xlane.f32.xlu1 %v2258_v23 }
0x19fe   :  { %v2257_v25 = vpop.xlane.xlu0 %2256 }
0x19ff   :  { %v2261_v58 = vsub.f32 %v2248_v14, %v2257_v25 }
0x1a01   :  { %v2263_v33 = vmul.f32 1.442695, %v2261_v58 }
0x1a02   :  { %v2260_v0 = vpop.xlane.xlu1 %2259 }
0x1a03   :  { %2969 = vpow2.f32 %v2263_v33  ;;  %v2262_v29 = vsub.f32 %v2251_v51, %v2260_v0 }
0x1a05   :  { %v2265_v17 = vmul.f32 1.442695, %v2262_v29 }
0x1a07   :  { %2971 = vpow2.f32 %v2265_v17 }
0x1a10   :  { %v2970_v5 = vpop.eup %2969 }
0x1a11   :  { %v2267_v15 = vsel %vm2254_vm4, %v2970_v5, 0.0 }
0x1a12   :  { %2268 = vadd.xlane.f32.xlu0 %v2267_v15 }
0x1a14   :  { %v2972_v19 = vpop.eup %2971 }
0x1a15   :  { %v2270_v20 = vsel %vm2254_vm4, %v2972_v19, 0.0 }
0x1a16   :  { %2271 = vadd.xlane.f32.xlu0 %v2270_v20 }
0x1a9b   :  { %v2269_v16 = vpop.xlane.xlu0 %2268 }
0x1a9c   :  { %2973 = vlog2.f32 %v2269_v16 }
0x1a9f   :  { %v2272_v34 = vpop.xlane.xlu0 %2271 }
0x1aa0   :  { %2975 = vlog2.f32 %v2272_v34 }
0x1aa9   :  { %v2974_v36 = vpop.eup %2973 }
0x1aaa   :  { %v2274_v60 = vmul.f32 0.6931472, %v2974_v36 }
0x1aac   :  { %v2277_v11 = vsub.f32 %v2261_v58, %v2274_v60 }
0x1aad   :  { %v2976_v63 = vpop.eup %2975 }
0x1aae   :  { %2279 = vst.msk [vmem:[#allocation2] sm:$0xff] %vm2254_vm4, %v2277_v11  ;;  %v2276_v61 = vmul.f32 0.6931472, %v2976_v63 }
0x1ab0   :  { %v2278_v62 = vsub.f32 %v2262_v29, %v2276_v61 }
0x1ab2   :  { %2280 = vst.msk [vmem:[#allocation2 + $0x8] sm:$0xff] %vm2254_vm4, %v2278_v62 }
0x1ab3   :  { %2996 = shalt.err (!%p2993_p4)
}
0x1ab4   :  { %s3013_s19 = smov 128   ;;  %s3014_s20 = smov 8  }
0x1ab5   :  { %2292 = dma.vmem_to_hbm [thread:$0]  %s2287_s22, 256, %s3675_s9, [#allocation3], %s3013_s19, %s3013_s19, %s3014_s20  }
0x1ab6   :  { %3005 = dma.done.wait [#allocation3], 256  }
0x1ab7   :  { %3006 = vsyncadd [#allocation3], 4294967040 }
0x1ab8   :  { %2296 = vsyncpa [#allocation3], 1 }

</bundles_post_ra>
